<compile_context>
chip_gen: v6e
topology: v6e:2x2x1
jax: 0.10.0
libtpu: 0.0.40
codegen_flags: <defaults>
</compile_context>

<pallas_src>
import math
import functools

import jax
import jax.numpy as jnp
from jax.experimental import pallas as pl
from jax.experimental.pallas import tpu as pltpu

# ---------------- small, forward-consistent config ----------------
B, S = 2, 8
M = B * S
TEXT_DIM = 32                  # args.text_dim
VOCAB_SIZE_V1 = 50             # args.vocab_size_v1
VOCAB_DIM_V1 = 8               # args.vocab_dim_v1
TEXT_FEATURES = [              # args.text_features, y[3] is the "use head" flag
    ("f0", None, None, True),
    ("f1", None, None, False),
    ("f2", None, None, True),
    ("f3", None, None, True),
]
NUM_FEATURES = len(TEXT_FEATURES)
VOCAB_SIZES = [11, 13, 11, 13]  # args.vocab_size (one lm_head each)
HIDDEN = 32                     # config.hidden_size
NUM_HEADS = 4
HEAD_DIM = HIDDEN // NUM_HEADS
FFN = 64
CONCAT_DIM = TEXT_DIM + VOCAB_DIM_V1 * NUM_FEATURES   # 64

USED_HEADS = tuple(i for i, f in enumerate(TEXT_FEATURES) if f[3] is True)  # (0, 2, 3)
USED_VOCABS = tuple(VOCAB_SIZES[i] for i in USED_HEADS)                     # (11, 11, 13)
_offsets, _off = [], 0
for _v in USED_VOCABS:
    _offsets.append(_off)
    _off += _v
USED_OFFSETS = tuple(_offsets)   # (0, 11, 22)
V_TOTAL = _off                   # 35
NUM_USED = len(USED_HEADS)

# ---------------- packed parameter slab layout ----------------
SLAB_LANES = 128                       # lane-dense width
# weight slab: each matrix occupies a row-range, lane offset 0
ROW_TL_W = 0                           # [CONCAT_DIM, HIDDEN]
ROW_WQ = ROW_TL_W + CONCAT_DIM         # 64   [H, H]
ROW_WK = ROW_WQ + HIDDEN               # 96   [H, H]
ROW_WV = ROW_WK + HIDDEN               # 128  [H, H]
ROW_WO = ROW_WV + HIDDEN               # 160  [H, H]
ROW_W1 = ROW_WO + HIDDEN               # 192  [H, FFN]
ROW_W2 = ROW_W1 + HIDDEN               # 224  [FFN, H]
ROW_LM = ROW_W2 + FFN                  # 288  [H, V_TOTAL] (zero-padded to 128 lanes)
W_ROWS = ROW_LM + HIDDEN               # 320

# bias / gain slab: one vector per row, lane offset 0
BR_TL_B, BR_BQ, BR_BK, BR_BV, BR_BO = 0, 1, 2, 3, 4
BR_G1, BR_BE1, BR_B1, BR_B2, BR_G2, BR_BE2 = 5, 6, 7, 8, 9, 10
B_ROWS = 11


# ---------------- fused forward kernel ----------------
def _layernorm(x, g, b, eps=1e-12):
    mu = jnp.mean(x, axis=-1, keepdims=True)
    var = jnp.mean((x - mu) ** 2, axis=-1, keepdims=True)
    return (x - mu) * jax.lax.rsqrt(var + eps) * g + b


def fused_forward_kernel(x_ref, attn_bias_ref, labels_ref, w_ref, b_ref,
                         loss_ref, *, num_heads, head_offsets, head_sizes):
    f32 = jnp.float32
    H = HIDDEN
    hd = H // num_heads
    scale = 1.0 / math.sqrt(hd)

    def W(row, rows, cols=None):          # static views into the weight slab
        if cols is None:
            return w_ref[row:row + rows, :]
        return w_ref[row:row + rows, 0:cols]

    def bvec(row, cols):                   # static views into the bias slab
        return b_ref[row:row + 1, 0:cols]

    x = x_ref[...]                                            # [M, CONCAT_DIM]
    m = x.shape[0]

    # ---- relu(text_linear(concat_input)) ----
    h0 = jnp.dot(x, W(ROW_TL_W, CONCAT_DIM, H),
                 preferred_element_type=f32) + bvec(BR_TL_B, H)
    h0 = jnp.maximum(h0, 0.0)                                 # [M, H]

    # ---- single BERT-style encoder layer (stand-in for self.encoder) ----
    # Q/K/V emitted lane-aligned at offset 0 (no lane-offset slicing).
    q = jnp.dot(h0, W(ROW_WQ, H, H), preferred_element_type=f32) + bvec(BR_BQ, H)
    k = jnp.dot(h0, W(ROW_WK, H, H), preferred_element_type=f32) + bvec(BR_BK, H)
    v = jnp.dot(h0, W(ROW_WV, H, H), preferred_element_type=f32) + bvec(BR_BV, H)

    # head-major [nh, M, hd]; all heads computed in batched contractions
    qh = jnp.transpose(q.reshape(m, num_heads, hd), (1, 0, 2))
    kh = jnp.transpose(k.reshape(m, num_heads, hd), (1, 0, 2))
    vh = jnp.transpose(v.reshape(m, num_heads, hd), (1, 0, 2))

    sc = jnp.einsum('hqd,hkd->hqk', qh, kh,
                    preferred_element_type=f32) * scale        # [nh, M, M]
    sc = sc + attn_bias_ref[...][None, :, :]                   # key-pad + batch-block mask
    sc_max = jnp.max(sc, axis=-1, keepdims=True)
    p = jnp.exp(sc - sc_max)
    p = p * pl.reciprocal(jnp.sum(p, axis=-1, keepdims=True), approx=True)
    ctx = jnp.einsum('hqk,hkd->hqd', p, vh,
                     preferred_element_type=f32)               # [nh, M, hd]
    ctx = jnp.transpose(ctx, (1, 0, 2)).reshape(m, H)          # [M, H]

    attn = jnp.dot(ctx, W(ROW_WO, H, H),
                   preferred_element_type=f32) + bvec(BR_BO, H)
    h1 = _layernorm(h0 + attn, bvec(BR_G1, H), bvec(BR_BE1, H))

    ff = jnp.dot(h1, W(ROW_W1, H, FFN),
                 preferred_element_type=f32) + bvec(BR_B1, FFN)
    # TODO(synk): tanh-approx GELU instead of HF's exact erf GELU.
    ff = jax.nn.gelu(ff, approximate=True)
    ff = jnp.dot(ff, W(ROW_W2, FFN, H),
                 preferred_element_type=f32) + bvec(BR_B2, H)
    out = _layernorm(h1 + ff, bvec(BR_G2, H), bvec(BR_BE2, H))  # [M, H]

    # ---- fused lm_heads (lane-dense, zero padded) + masked cross-entropy ----
    logits = jnp.dot(out, W(ROW_LM, H), preferred_element_type=f32)  # [M, 128]
    col = jax.lax.broadcasted_iota(jnp.int32, logits.shape, 1)        # [M, 128]

    labels = labels_ref[...]        # [M, NUM_USED] int32; fused-vocab index, -1 = ignore
    total = 0.0
    for j, (off, vsz) in enumerate(zip(head_offsets, head_sizes)):
        y = labels[:, j:j + 1]                                  # [M, 1]
        validf = (y >= 0).astype(f32)                           # [M, 1]
        in_seg = (col >= off) & (col < off + vsz)
        seg = jnp.where(in_seg, logits, -1e30)                  # f32-only sentinel
        smax = jnp.max(seg, axis=-1, keepdims=True)
        lse = smax + jnp.log(jnp.sum(jnp.exp(seg - smax), axis=-1, keepdims=True))
        lbl = jnp.sum(jnp.where(col == y, logits, 0.0), axis=-1, keepdims=True)
        num = jnp.sum((lse - lbl) * validf)
        # all-ignored head contributes 0 (PyTorch would give NaN) -- intentional guard
        den = jnp.maximum(jnp.sum(validf), 1.0)
        total = total + num / den
    loss_ref[0] = total


def fused_forward(x, attn_bias, labels, w_slab, b_slab):
    vspec = pl.BlockSpec(memory_space=pltpu.MemorySpace.VMEM)
    kernel = functools.partial(fused_forward_kernel,
                               num_heads=NUM_HEADS,
                               head_offsets=USED_OFFSETS,
                               head_sizes=USED_VOCABS)
    loss = pl.pallas_call(
        kernel,
        out_shape=jax.ShapeDtypeStruct((1,), jnp.float32),
        in_specs=[vspec] * 5,
        out_specs=pl.BlockSpec(memory_space=pltpu.MemorySpace.SMEM),
    )(x, attn_bias, labels, w_slab, b_slab)
    return loss[0]


# ---------------- parameter init (std=0.02 like _init_weights) ----------------
def init_params(key):
    ks = jax.random.split(key, 16)

    def w(k, shape):
        return 0.02 * jax.random.normal(k, shape, jnp.float32)

    emb = w(ks[0], (VOCAB_SIZE_V1, VOCAB_DIM_V1))
    tl_w = w(ks[1], (CONCAT_DIM, HIDDEN))
    wq = w(ks[2], (HIDDEN, HIDDEN))
    wk = w(ks[3], (HIDDEN, HIDDEN))
    wv = w(ks[4], (HIDDEN, HIDDEN))
    wo = w(ks[5], (HIDDEN, HIDDEN))
    w1 = w(ks[6], (HIDDEN, FFN))
    w2 = w(ks[7], (FFN, HIDDEN))
    heads = [w(ks[8 + i], (HIDDEN, v)) for i, v in enumerate(VOCAB_SIZES)]
    lm_w = jnp.concatenate([heads[i] for i in USED_HEADS], axis=1)   # [H, V_TOTAL]

    w_slab = jnp.zeros((W_ROWS, SLAB_LANES), jnp.float32)

    def put(slab, row, mat):
        r, c = mat.shape
        return slab.at[row:row + r, 0:c].set(mat)

    w_slab = put(w_slab, ROW_TL_W, tl_w)
    w_slab = put(w_slab, ROW_WQ, wq)
    w_slab = put(w_slab, ROW_WK, wk)
    w_slab = put(w_slab, ROW_WV, wv)
    w_slab = put(w_slab, ROW_WO, wo)
    w_slab = put(w_slab, ROW_W1, w1)
    w_slab = put(w_slab, ROW_W2, w2)
    w_slab = put(w_slab, ROW_LM, lm_w)

    b_slab = jnp.zeros((B_ROWS, SLAB_LANES), jnp.float32)   # linear biases / LN betas = 0
    b_slab = b_slab.at[BR_G1, 0:HIDDEN].set(1.0)            # LN gains = 1
    b_slab = b_slab.at[BR_G2, 0:HIDDEN].set(1.0)
    return {'emb': emb, 'w_slab': w_slab, 'b_slab': b_slab}


# ---------------- full forward (gather/concat/mask glue in XLA, rest in Pallas) ----------------
@jax.jit
def model_forward(params, inputs, inputs_ids, masks, labels):
    b_, s_, _ = inputs.shape
    m = b_ * s_

    # embedding lookup (gather) + view + concat, flattened to [M, CONCAT_DIM]
    emb = params['emb'][inputs_ids].reshape(b_, s_, -1)
    x = jnp.concatenate([inputs.astype(jnp.float32), emb],
                        axis=-1).reshape(m, CONCAT_DIM)

    # additive attention bias: HF-style key padding (-10000) + block-diagonal batch mask
    key_bias = (masks.astype(jnp.float32).reshape(m) - 1.0) * 10000.0
    batch_ids = jnp.repeat(jnp.arange(b_, dtype=jnp.int32), s_)
    same_batch = batch_ids[:, None] == batch_ids[None, :]
    attn_bias = jnp.where(same_batch, key_bias[None, :], -10000.0)     # [M, M]

    # labels for the used heads, shifted into the fused-vocab index space; -1 = ignore
    labels_used = jnp.stack([labels[:, :, i] for i in USED_HEADS], axis=-1)
    labels_used = labels_used.reshape(m, NUM_USED).astype(jnp.int32)
    offs = jnp.asarray(USED_OFFSETS, jnp.int32)
    labels_shifted = jnp.where(labels_used == -100, -1, labels_used + offs[None, :])

    return fused_forward(x, attn_bias, labels_shifted,
                         params['w_slab'], params['b_slab'])


if __name__ == "__main__":
    key = jax.random.PRNGKey(0)
    params = init_params(jax.random.fold_in(key, 1))

    inputs = jax.random.normal(jax.random.fold_in(key, 2),
                               (B, S, TEXT_DIM), jnp.float32)
    inputs_ids = jax.random.randint(jax.random.fold_in(key, 3),
                                    (B, S, NUM_FEATURES), 0, VOCAB_SIZE_V1)
    masks = (jax.random.uniform(jax.random.fold_in(key, 4), (B, S)) > 0.1
             ).astype(jnp.float32)

    labs = []
    for idx, v in enumerate(VOCAB_SIZES):
        vals = jax.random.randint(jax.random.fold_in(key, 10 + idx), (B, S), 0, v)
        drop = jax.random.uniform(jax.random.fold_in(key, 20 + idx), (B, S)) < 0.25
        labs.append(jnp.where(drop, -100, vals))
    labels = jnp.stack(labs, axis=-1).astype(jnp.int32)                 # [B,S,4]

    loss = model_forward(params, inputs, inputs_ids, masks, labels)
    loss = jax.block_until_ready(loss)
    assert bool(jnp.isfinite(loss))
    print("KERNEL_OK")
</pallas_src>

<mosaic_0001>
module attributes {stable_mosaic.version = 11 : i64} {
  func.func @fused_forward_kernel(%arg0: memref<16x64xf32, #tpu.memory_space<vmem>>, %arg1: memref<16x16xf32, #tpu.memory_space<vmem>>, %arg2: memref<16x3xi32, #tpu.memory_space<vmem>>, %arg3: memref<320x128xf32, #tpu.memory_space<vmem>>, %arg4: memref<11x128xf32, #tpu.memory_space<vmem>>, %arg5: memref<1xf32, #tpu.memory_space<smem>>) attributes {dimension_semantics = [], scalar_prefetch = 0 : i64, scratch_operands = 0 : i64, tpu.core_type = #tpu.core_type<tc>} {
    %c0 = arith.constant 0 : index
    %c0_0 = arith.constant 0 : index
    %0 = vector.load %arg0[%c0, %c0_0] : memref<16x64xf32, #tpu.memory_space<vmem>>, vector<16x64xf32>
    %c0_1 = arith.constant 0 : index
    %c0_2 = arith.constant 0 : index
    %1 = vector.load %arg3[%c0_1, %c0_2] : memref<320x128xf32, #tpu.memory_space<vmem>>, vector<64x32xf32>
    %cst = arith.constant dense<0.000000e+00> : vector<16x32xf32>
    %2 = tpu.matmul %0, %1, %cst {dimension_numbers = #tpu.dot_dimension_numbers<[1], [0], [0], [1], [0, 0, 1, 1], [], []>} : vector<16x64xf32>, vector<64x32xf32>, vector<16x32xf32> -> vector<16x32xf32>
    %c0_3 = arith.constant 0 : index
    %c0_4 = arith.constant 0 : index
    %3 = vector.load %arg4[%c0_3, %c0_4] : memref<11x128xf32, #tpu.memory_space<vmem>>, vector<1x32xf32>
    %4 = vector.broadcast %3 : vector<1x32xf32> to vector<16x32xf32>
    %5 = arith.addf %2, %4 : vector<16x32xf32>
    %cst_5 = arith.constant 0.000000e+00 : f32
    %6 = vector.broadcast %cst_5 : f32 to vector<16x32xf32>
    %7 = arith.maximumf %5, %6 : vector<16x32xf32>
    %c64 = arith.constant 64 : index
    %c0_6 = arith.constant 0 : index
    %8 = vector.load %arg3[%c64, %c0_6] : memref<320x128xf32, #tpu.memory_space<vmem>>, vector<32x32xf32>
    %cst_7 = arith.constant dense<0.000000e+00> : vector<16x32xf32>
    %9 = tpu.matmul %7, %8, %cst_7 {dimension_numbers = #tpu.dot_dimension_numbers<[1], [0], [0], [1], [0, 0, 1, 1], [], []>} : vector<16x32xf32>, vector<32x32xf32>, vector<16x32xf32> -> vector<16x32xf32>
    %c1 = arith.constant 1 : index
    %c0_8 = arith.constant 0 : index
    %10 = vector.load %arg4[%c1, %c0_8] : memref<11x128xf32, #tpu.memory_space<vmem>>, vector<1x32xf32>
    %11 = vector.broadcast %10 : vector<1x32xf32> to vector<16x32xf32>
    %12 = arith.addf %9, %11 : vector<16x32xf32>
    %c96 = arith.constant 96 : index
    %c0_9 = arith.constant 0 : index
    %13 = vector.load %arg3[%c96, %c0_9] : memref<320x128xf32, #tpu.memory_space<vmem>>, vector<32x32xf32>
    %cst_10 = arith.constant dense<0.000000e+00> : vector<16x32xf32>
    %14 = tpu.matmul %7, %13, %cst_10 {dimension_numbers = #tpu.dot_dimension_numbers<[1], [0], [0], [1], [0, 0, 1, 1], [], []>} : vector<16x32xf32>, vector<32x32xf32>, vector<16x32xf32> -> vector<16x32xf32>
    %c2 = arith.constant 2 : index
    %c0_11 = arith.constant 0 : index
    %15 = vector.load %arg4[%c2, %c0_11] : memref<11x128xf32, #tpu.memory_space<vmem>>, vector<1x32xf32>
    %16 = vector.broadcast %15 : vector<1x32xf32> to vector<16x32xf32>
    %17 = arith.addf %14, %16 : vector<16x32xf32>
    %c128 = arith.constant 128 : index
    %c0_12 = arith.constant 0 : index
    %18 = vector.load %arg3[%c128, %c0_12] : memref<320x128xf32, #tpu.memory_space<vmem>>, vector<32x32xf32>
    %cst_13 = arith.constant dense<0.000000e+00> : vector<16x32xf32>
    %19 = tpu.matmul %7, %18, %cst_13 {dimension_numbers = #tpu.dot_dimension_numbers<[1], [0], [0], [1], [0, 0, 1, 1], [], []>} : vector<16x32xf32>, vector<32x32xf32>, vector<16x32xf32> -> vector<16x32xf32>
    %c3 = arith.constant 3 : index
    %c0_14 = arith.constant 0 : index
    %20 = vector.load %arg4[%c3, %c0_14] : memref<11x128xf32, #tpu.memory_space<vmem>>, vector<1x32xf32>
    %21 = vector.broadcast %20 : vector<1x32xf32> to vector<16x32xf32>
    %22 = arith.addf %19, %21 : vector<16x32xf32>
    %23 = vector.shape_cast %12 : vector<16x32xf32> to vector<16x4x8xf32>
    %24 = tpu.transpose %23, [1, 0, 2] : vector<16x4x8xf32> -> vector<4x16x8xf32>
    %25 = vector.shape_cast %17 : vector<16x32xf32> to vector<16x4x8xf32>
    %26 = tpu.transpose %25, [1, 0, 2] : vector<16x4x8xf32> -> vector<4x16x8xf32>
    %27 = vector.shape_cast %22 : vector<16x32xf32> to vector<16x4x8xf32>
    %28 = tpu.transpose %27, [1, 0, 2] : vector<16x4x8xf32> -> vector<4x16x8xf32>
    "tpu.trace_start"() <{level = 10 : i32, message = "hqd,hkd->hqk"}> : () -> ()
    %cst_15 = arith.constant dense<0.000000e+00> : vector<4x16x16xf32>
    %29 = tpu.matmul %24, %26, %cst_15 {dimension_numbers = #tpu.dot_dimension_numbers<[2], [2], [1], [1], [0, 0, 0, 1, 1, 1], [0], [0]>} : vector<4x16x8xf32>, vector<4x16x8xf32>, vector<4x16x16xf32> -> vector<4x16x16xf32>
    "tpu.trace_stop"() : () -> ()
    %cst_16 = arith.constant 0.353553385 : f32
    %30 = vector.broadcast %cst_16 : f32 to vector<4x16x16xf32>
    %31 = arith.mulf %29, %30 : vector<4x16x16xf32>
    %c0_17 = arith.constant 0 : index
    %c0_18 = arith.constant 0 : index
    %32 = vector.load %arg1[%c0_17, %c0_18] : memref<16x16xf32, #tpu.memory_space<vmem>>, vector<16x16xf32>
    %33 = vector.shape_cast %32 : vector<16x16xf32> to vector<1x16x16xf32>
    %34 = vector.broadcast %33 : vector<1x16x16xf32> to vector<4x16x16xf32>
    %35 = arith.addf %31, %34 : vector<4x16x16xf32>
    %cst_19 = arith.constant dense<0xFF800000> : vector<4x16xf32>
    %36 = vector.multi_reduction <maximumf>, %35, %cst_19 [2] : vector<4x16x16xf32> to vector<4x16xf32>
    %37 = vector.shape_cast %36 : vector<4x16xf32> to vector<4x16x1xf32>
    %38 = vector.broadcast %37 : vector<4x16x1xf32> to vector<4x16x16xf32>
    %39 = arith.subf %35, %38 : vector<4x16x16xf32>
    %40 = math.exp %39 : vector<4x16x16xf32>
    %cst_20 = arith.constant dense<0.000000e+00> : vector<4x16xf32>
    %41 = vector.multi_reduction <add>, %40, %cst_20 [2] : vector<4x16x16xf32> to vector<4x16xf32>
    %42 = vector.shape_cast %41 : vector<4x16xf32> to vector<4x16x1xf32>
    %43 = tpu.reciprocal %42 {approx = true} : vector<4x16x1xf32> -> vector<4x16x1xf32>
    %44 = vector.broadcast %43 : vector<4x16x1xf32> to vector<4x16x16xf32>
    %45 = arith.mulf %40, %44 : vector<4x16x16xf32>
    "tpu.trace_start"() <{level = 10 : i32, message = "hqk,hkd->hqd"}> : () -> ()
    %cst_21 = arith.constant dense<0.000000e+00> : vector<4x16x8xf32>
    %46 = tpu.matmul %45, %28, %cst_21 {dimension_numbers = #tpu.dot_dimension_numbers<[2], [1], [1], [2], [0, 0, 0, 1, 1, 2], [0], [0]>} : vector<4x16x16xf32>, vector<4x16x8xf32>, vector<4x16x8xf32> -> vector<4x16x8xf32>
    "tpu.trace_stop"() : () -> ()
    %47 = tpu.transpose %46, [1, 0, 2] : vector<4x16x8xf32> -> vector<16x4x8xf32>
    %48 = vector.shape_cast %47 : vector<16x4x8xf32> to vector<16x32xf32>
    %c160 = arith.constant 160 : index
    %c0_22 = arith.constant 0 : index
    %49 = vector.load %arg3[%c160, %c0_22] : memref<320x128xf32, #tpu.memory_space<vmem>>, vector<32x32xf32>
    %cst_23 = arith.constant dense<0.000000e+00> : vector<16x32xf32>
    %50 = tpu.matmul %48, %49, %cst_23 {dimension_numbers = #tpu.dot_dimension_numbers<[1], [0], [0], [1], [0, 0, 1, 1], [], []>} : vector<16x32xf32>, vector<32x32xf32>, vector<16x32xf32> -> vector<16x32xf32>
    %c4 = arith.constant 4 : index
    %c0_24 = arith.constant 0 : index
    %51 = vector.load %arg4[%c4, %c0_24] : memref<11x128xf32, #tpu.memory_space<vmem>>, vector<1x32xf32>
    %52 = vector.broadcast %51 : vector<1x32xf32> to vector<16x32xf32>
    %53 = arith.addf %50, %52 : vector<16x32xf32>
    %54 = arith.addf %7, %53 : vector<16x32xf32>
    %c5 = arith.constant 5 : index
    %c0_25 = arith.constant 0 : index
    %55 = vector.load %arg4[%c5, %c0_25] : memref<11x128xf32, #tpu.memory_space<vmem>>, vector<1x32xf32>
    %c6 = arith.constant 6 : index
    %c0_26 = arith.constant 0 : index
    %56 = vector.load %arg4[%c6, %c0_26] : memref<11x128xf32, #tpu.memory_space<vmem>>, vector<1x32xf32>
    %cst_27 = arith.constant dense<0.000000e+00> : vector<16xf32>
    %57 = vector.multi_reduction <add>, %54, %cst_27 [1] : vector<16x32xf32> to vector<16xf32>
    %58 = vector.shape_cast %57 : vector<16xf32> to vector<16x1xf32>
    %cst_28 = arith.constant 3.200000e+01 : f32
    %59 = vector.broadcast %cst_28 : f32 to vector<16x1xf32>
    %60 = arith.divf %58, %59 : vector<16x1xf32>
    %61 = vector.broadcast %60 : vector<16x1xf32> to vector<16x32xf32>
    %62 = arith.subf %54, %61 : vector<16x32xf32>
    %63 = arith.mulf %62, %62 : vector<16x32xf32>
    %cst_29 = arith.constant dense<0.000000e+00> : vector<16xf32>
    %64 = vector.multi_reduction <add>, %63, %cst_29 [1] : vector<16x32xf32> to vector<16xf32>
    %65 = vector.shape_cast %64 : vector<16xf32> to vector<16x1xf32>
    %cst_30 = arith.constant 3.200000e+01 : f32
    %66 = vector.broadcast %cst_30 : f32 to vector<16x1xf32>
    %67 = arith.divf %65, %66 : vector<16x1xf32>
    %68 = vector.broadcast %60 : vector<16x1xf32> to vector<16x32xf32>
    %69 = arith.subf %54, %68 : vector<16x32xf32>
    %cst_31 = arith.constant 9.99999996E-13 : f32
    %70 = vector.broadcast %cst_31 : f32 to vector<16x1xf32>
    %71 = arith.addf %67, %70 : vector<16x1xf32>
    %72 = math.rsqrt %71 : vector<16x1xf32>
    %73 = vector.broadcast %72 : vector<16x1xf32> to vector<16x32xf32>
    %74 = arith.mulf %69, %73 : vector<16x32xf32>
    %75 = vector.broadcast %55 : vector<1x32xf32> to vector<16x32xf32>
    %76 = arith.mulf %74, %75 : vector<16x32xf32>
    %77 = vector.broadcast %56 : vector<1x32xf32> to vector<16x32xf32>
    %78 = arith.addf %76, %77 : vector<16x32xf32>
    %c192 = arith.constant 192 : index
    %c0_32 = arith.constant 0 : index
    %79 = vector.load %arg3[%c192, %c0_32] : memref<320x128xf32, #tpu.memory_space<vmem>>, vector<32x64xf32>
    %cst_33 = arith.constant dense<0.000000e+00> : vector<16x64xf32>
    %80 = tpu.matmul %78, %79, %cst_33 {dimension_numbers = #tpu.dot_dimension_numbers<[1], [0], [0], [1], [0, 0, 1, 1], [], []>} : vector<16x32xf32>, vector<32x64xf32>, vector<16x64xf32> -> vector<16x64xf32>
    %c7 = arith.constant 7 : index
    %c0_34 = arith.constant 0 : index
    %81 = vector.load %arg4[%c7, %c0_34] : memref<11x128xf32, #tpu.memory_space<vmem>>, vector<1x64xf32>
    %82 = vector.broadcast %81 : vector<1x64xf32> to vector<16x64xf32>
    %83 = arith.addf %80, %82 : vector<16x64xf32>
    %84 = arith.mulf %83, %83 : vector<16x64xf32>
    %85 = arith.mulf %83, %84 : vector<16x64xf32>
    %cst_35 = arith.constant 4.471500e-02 : f32
    %86 = vector.broadcast %cst_35 : f32 to vector<16x64xf32>
    %87 = arith.mulf %86, %85 : vector<16x64xf32>
    %88 = arith.addf %83, %87 : vector<16x64xf32>
    %cst_36 = arith.constant 0.797884583 : f32
    %89 = vector.broadcast %cst_36 : f32 to vector<16x64xf32>
    %90 = arith.mulf %89, %88 : vector<16x64xf32>
    %91 = math.tanh %90 : vector<16x64xf32>
    %cst_37 = arith.constant 1.000000e+00 : f32
    %92 = vector.broadcast %cst_37 : f32 to vector<16x64xf32>
    %93 = arith.addf %92, %91 : vector<16x64xf32>
    %cst_38 = arith.constant 5.000000e-01 : f32
    %94 = vector.broadcast %cst_38 : f32 to vector<16x64xf32>
    %95 = arith.mulf %94, %93 : vector<16x64xf32>
    %96 = arith.mulf %83, %95 : vector<16x64xf32>
    %c224 = arith.constant 224 : index
    %c0_39 = arith.constant 0 : index
    %97 = vector.load %arg3[%c224, %c0_39] : memref<320x128xf32, #tpu.memory_space<vmem>>, vector<64x32xf32>
    %cst_40 = arith.constant dense<0.000000e+00> : vector<16x32xf32>
    %98 = tpu.matmul %96, %97, %cst_40 {dimension_numbers = #tpu.dot_dimension_numbers<[1], [0], [0], [1], [0, 0, 1, 1], [], []>} : vector<16x64xf32>, vector<64x32xf32>, vector<16x32xf32> -> vector<16x32xf32>
    %c8 = arith.constant 8 : index
    %c0_41 = arith.constant 0 : index
    %99 = vector.load %arg4[%c8, %c0_41] : memref<11x128xf32, #tpu.memory_space<vmem>>, vector<1x32xf32>
    %100 = vector.broadcast %99 : vector<1x32xf32> to vector<16x32xf32>
    %101 = arith.addf %98, %100 : vector<16x32xf32>
    %102 = arith.addf %78, %101 : vector<16x32xf32>
    %c9 = arith.constant 9 : index
    %c0_42 = arith.constant 0 : index
    %103 = vector.load %arg4[%c9, %c0_42] : memref<11x128xf32, #tpu.memory_space<vmem>>, vector<1x32xf32>
    %c10 = arith.constant 10 : index
    %c0_43 = arith.constant 0 : index
    %104 = vector.load %arg4[%c10, %c0_43] : memref<11x128xf32, #tpu.memory_space<vmem>>, vector<1x32xf32>
    %cst_44 = arith.constant dense<0.000000e+00> : vector<16xf32>
    %105 = vector.multi_reduction <add>, %102, %cst_44 [1] : vector<16x32xf32> to vector<16xf32>
    %106 = vector.shape_cast %105 : vector<16xf32> to vector<16x1xf32>
    %cst_45 = arith.constant 3.200000e+01 : f32
    %107 = vector.broadcast %cst_45 : f32 to vector<16x1xf32>
    %108 = arith.divf %106, %107 : vector<16x1xf32>
    %109 = vector.broadcast %108 : vector<16x1xf32> to vector<16x32xf32>
    %110 = arith.subf %102, %109 : vector<16x32xf32>
    %111 = arith.mulf %110, %110 : vector<16x32xf32>
    %cst_46 = arith.constant dense<0.000000e+00> : vector<16xf32>
    %112 = vector.multi_reduction <add>, %111, %cst_46 [1] : vector<16x32xf32> to vector<16xf32>
    %113 = vector.shape_cast %112 : vector<16xf32> to vector<16x1xf32>
    %cst_47 = arith.constant 3.200000e+01 : f32
    %114 = vector.broadcast %cst_47 : f32 to vector<16x1xf32>
    %115 = arith.divf %113, %114 : vector<16x1xf32>
    %116 = vector.broadcast %108 : vector<16x1xf32> to vector<16x32xf32>
    %117 = arith.subf %102, %116 : vector<16x32xf32>
    %cst_48 = arith.constant 9.99999996E-13 : f32
    %118 = vector.broadcast %cst_48 : f32 to vector<16x1xf32>
    %119 = arith.addf %115, %118 : vector<16x1xf32>
    %120 = math.rsqrt %119 : vector<16x1xf32>
    %121 = vector.broadcast %120 : vector<16x1xf32> to vector<16x32xf32>
    %122 = arith.mulf %117, %121 : vector<16x32xf32>
    %123 = vector.broadcast %103 : vector<1x32xf32> to vector<16x32xf32>
    %124 = arith.mulf %122, %123 : vector<16x32xf32>
    %125 = vector.broadcast %104 : vector<1x32xf32> to vector<16x32xf32>
    %126 = arith.addf %124, %125 : vector<16x32xf32>
    %c288 = arith.constant 288 : index
    %c0_49 = arith.constant 0 : index
    %127 = vector.load %arg3[%c288, %c0_49] : memref<320x128xf32, #tpu.memory_space<vmem>>, vector<32x128xf32>
    %cst_50 = arith.constant dense<0.000000e+00> : vector<16x128xf32>
    %128 = tpu.matmul %126, %127, %cst_50 {dimension_numbers = #tpu.dot_dimension_numbers<[1], [0], [0], [1], [0, 0, 1, 1], [], []>} : vector<16x32xf32>, vector<32x128xf32>, vector<16x128xf32> -> vector<16x128xf32>
    %129 = tpu.iota {dimensions = array<i32: 1>} : vector<16x128xi32>
    %c0_51 = arith.constant 0 : index
    %c0_52 = arith.constant 0 : index
    %130 = vector.load %arg2[%c0_51, %c0_52] : memref<16x3xi32, #tpu.memory_space<vmem>>, vector<16x3xi32>
    %131 = vector.extract_strided_slice %130 {offsets = [0, 0], sizes = [16, 1], strides = [1, 1]} : vector<16x3xi32> to vector<16x1xi32>
    %c0_i32 = arith.constant 0 : i32
    %132 = vector.broadcast %c0_i32 : i32 to vector<16x1xi32>
    %133 = arith.cmpi sge, %131, %132 : vector<16x1xi32>
    %134 = arith.extui %133 : vector<16x1xi1> to vector<16x1xi32>
    %135 = arith.sitofp %134 : vector<16x1xi32> to vector<16x1xf32>
    %c0_i32_53 = arith.constant 0 : i32
    %136 = vector.broadcast %c0_i32_53 : i32 to vector<16x128xi32>
    %137 = arith.cmpi sge, %129, %136 : vector<16x128xi32>
    %c11_i32 = arith.constant 11 : i32
    %138 = vector.broadcast %c11_i32 : i32 to vector<16x128xi32>
    %139 = arith.cmpi slt, %129, %138 : vector<16x128xi32>
    %140 = arith.andi %137, %139 : vector<16x128xi1>
    %cst_54 = arith.constant -1.000000e+30 : f32
    %141 = vector.broadcast %cst_54 : f32 to vector<16x128xf32>
    %142 = arith.select %140, %128, %141 : vector<16x128xi1>, vector<16x128xf32>
    %cst_55 = arith.constant dense<0xFF800000> : vector<16xf32>
    %143 = vector.multi_reduction <maximumf>, %142, %cst_55 [1] : vector<16x128xf32> to vector<16xf32>
    %144 = vector.shape_cast %143 : vector<16xf32> to vector<16x1xf32>
    %145 = vector.broadcast %144 : vector<16x1xf32> to vector<16x128xf32>
    %146 = arith.subf %142, %145 : vector<16x128xf32>
    %147 = math.exp %146 : vector<16x128xf32>
    %cst_56 = arith.constant dense<0.000000e+00> : vector<16xf32>
    %148 = vector.multi_reduction <add>, %147, %cst_56 [1] : vector<16x128xf32> to vector<16xf32>
    %149 = vector.shape_cast %148 : vector<16xf32> to vector<16x1xf32>
    %150 = math.log %149 : vector<16x1xf32>
    %151 = arith.addf %144, %150 : vector<16x1xf32>
    %152 = vector.broadcast %131 : vector<16x1xi32> to vector<16x128xi32>
    %153 = arith.cmpi eq, %129, %152 : vector<16x128xi32>
    %cst_57 = arith.constant 0.000000e+00 : f32
    %154 = vector.broadcast %cst_57 : f32 to vector<16x128xf32>
    %155 = arith.select %153, %128, %154 : vector<16x128xi1>, vector<16x128xf32>
    %cst_58 = arith.constant dense<0.000000e+00> : vector<16xf32>
    %156 = vector.multi_reduction <add>, %155, %cst_58 [1] : vector<16x128xf32> to vector<16xf32>
    %157 = vector.shape_cast %156 : vector<16xf32> to vector<16x1xf32>
    %158 = arith.subf %151, %157 : vector<16x1xf32>
    %159 = arith.mulf %158, %135 : vector<16x1xf32>
    %160 = vector.shape_cast %159 : vector<16x1xf32> to vector<1x16x1xf32>
    %cst_59 = arith.constant dense<0.000000e+00> : vector<1xf32>
    %161 = vector.multi_reduction <add>, %160, %cst_59 [1, 2] : vector<1x16x1xf32> to vector<1xf32>
    %162 = vector.shape_cast %161 : vector<1xf32> to vector<1x1x1xf32>
    %163 = vector.extract %162[0, 0, 0] : f32 from vector<1x1x1xf32>
    %164 = vector.shape_cast %135 : vector<16x1xf32> to vector<1x16x1xf32>
    %cst_60 = arith.constant dense<0.000000e+00> : vector<1xf32>
    %165 = vector.multi_reduction <add>, %164, %cst_60 [1, 2] : vector<1x16x1xf32> to vector<1xf32>
    %166 = vector.shape_cast %165 : vector<1xf32> to vector<1x1x1xf32>
    %167 = vector.extract %166[0, 0, 0] : f32 from vector<1x1x1xf32>
    %cst_61 = arith.constant 1.000000e+00 : f32
    %168 = arith.maximumf %167, %cst_61 : f32
    %169 = arith.divf %163, %168 : f32
    %cst_62 = arith.constant 0.000000e+00 : f32
    %170 = arith.addf %cst_62, %169 : f32
    %171 = vector.extract_strided_slice %130 {offsets = [0, 1], sizes = [16, 1], strides = [1, 1]} : vector<16x3xi32> to vector<16x1xi32>
    %c0_i32_63 = arith.constant 0 : i32
    %172 = vector.broadcast %c0_i32_63 : i32 to vector<16x1xi32>
    %173 = arith.cmpi sge, %171, %172 : vector<16x1xi32>
    %174 = arith.extui %173 : vector<16x1xi1> to vector<16x1xi32>
    %175 = arith.sitofp %174 : vector<16x1xi32> to vector<16x1xf32>
    %c11_i32_64 = arith.constant 11 : i32
    %176 = vector.broadcast %c11_i32_64 : i32 to vector<16x128xi32>
    %177 = arith.cmpi sge, %129, %176 : vector<16x128xi32>
    %c22_i32 = arith.constant 22 : i32
    %178 = vector.broadcast %c22_i32 : i32 to vector<16x128xi32>
    %179 = arith.cmpi slt, %129, %178 : vector<16x128xi32>
    %180 = arith.andi %177, %179 : vector<16x128xi1>
    %cst_65 = arith.constant -1.000000e+30 : f32
    %181 = vector.broadcast %cst_65 : f32 to vector<16x128xf32>
    %182 = arith.select %180, %128, %181 : vector<16x128xi1>, vector<16x128xf32>
    %cst_66 = arith.constant dense<0xFF800000> : vector<16xf32>
    %183 = vector.multi_reduction <maximumf>, %182, %cst_66 [1] : vector<16x128xf32> to vector<16xf32>
    %184 = vector.shape_cast %183 : vector<16xf32> to vector<16x1xf32>
    %185 = vector.broadcast %184 : vector<16x1xf32> to vector<16x128xf32>
    %186 = arith.subf %182, %185 : vector<16x128xf32>
    %187 = math.exp %186 : vector<16x128xf32>
    %cst_67 = arith.constant dense<0.000000e+00> : vector<16xf32>
    %188 = vector.multi_reduction <add>, %187, %cst_67 [1] : vector<16x128xf32> to vector<16xf32>
    %189 = vector.shape_cast %188 : vector<16xf32> to vector<16x1xf32>
    %190 = math.log %189 : vector<16x1xf32>
    %191 = arith.addf %184, %190 : vector<16x1xf32>
    %192 = vector.broadcast %171 : vector<16x1xi32> to vector<16x128xi32>
    %193 = arith.cmpi eq, %129, %192 : vector<16x128xi32>
    %cst_68 = arith.constant 0.000000e+00 : f32
    %194 = vector.broadcast %cst_68 : f32 to vector<16x128xf32>
    %195 = arith.select %193, %128, %194 : vector<16x128xi1>, vector<16x128xf32>
    %cst_69 = arith.constant dense<0.000000e+00> : vector<16xf32>
    %196 = vector.multi_reduction <add>, %195, %cst_69 [1] : vector<16x128xf32> to vector<16xf32>
    %197 = vector.shape_cast %196 : vector<16xf32> to vector<16x1xf32>
    %198 = arith.subf %191, %197 : vector<16x1xf32>
    %199 = arith.mulf %198, %175 : vector<16x1xf32>
    %200 = vector.shape_cast %199 : vector<16x1xf32> to vector<1x16x1xf32>
    %cst_70 = arith.constant dense<0.000000e+00> : vector<1xf32>
    %201 = vector.multi_reduction <add>, %200, %cst_70 [1, 2] : vector<1x16x1xf32> to vector<1xf32>
    %202 = vector.shape_cast %201 : vector<1xf32> to vector<1x1x1xf32>
    %203 = vector.extract %202[0, 0, 0] : f32 from vector<1x1x1xf32>
    %204 = vector.shape_cast %175 : vector<16x1xf32> to vector<1x16x1xf32>
    %cst_71 = arith.constant dense<0.000000e+00> : vector<1xf32>
    %205 = vector.multi_reduction <add>, %204, %cst_71 [1, 2] : vector<1x16x1xf32> to vector<1xf32>
    %206 = vector.shape_cast %205 : vector<1xf32> to vector<1x1x1xf32>
    %207 = vector.extract %206[0, 0, 0] : f32 from vector<1x1x1xf32>
    %cst_72 = arith.constant 1.000000e+00 : f32
    %208 = arith.maximumf %207, %cst_72 : f32
    %209 = arith.divf %203, %208 : f32
    %210 = arith.addf %170, %209 : f32
    %211 = vector.extract_strided_slice %130 {offsets = [0, 2], sizes = [16, 1], strides = [1, 1]} : vector<16x3xi32> to vector<16x1xi32>
    %c0_i32_73 = arith.constant 0 : i32
    %212 = vector.broadcast %c0_i32_73 : i32 to vector<16x1xi32>
    %213 = arith.cmpi sge, %211, %212 : vector<16x1xi32>
    %214 = arith.extui %213 : vector<16x1xi1> to vector<16x1xi32>
    %215 = arith.sitofp %214 : vector<16x1xi32> to vector<16x1xf32>
    %c22_i32_74 = arith.constant 22 : i32
    %216 = vector.broadcast %c22_i32_74 : i32 to vector<16x128xi32>
    %217 = arith.cmpi sge, %129, %216 : vector<16x128xi32>
    %c35_i32 = arith.constant 35 : i32
    %218 = vector.broadcast %c35_i32 : i32 to vector<16x128xi32>
    %219 = arith.cmpi slt, %129, %218 : vector<16x128xi32>
    %220 = arith.andi %217, %219 : vector<16x128xi1>
    %cst_75 = arith.constant -1.000000e+30 : f32
    %221 = vector.broadcast %cst_75 : f32 to vector<16x128xf32>
    %222 = arith.select %220, %128, %221 : vector<16x128xi1>, vector<16x128xf32>
    %cst_76 = arith.constant dense<0xFF800000> : vector<16xf32>
    %223 = vector.multi_reduction <maximumf>, %222, %cst_76 [1] : vector<16x128xf32> to vector<16xf32>
    %224 = vector.shape_cast %223 : vector<16xf32> to vector<16x1xf32>
    %225 = vector.broadcast %224 : vector<16x1xf32> to vector<16x128xf32>
    %226 = arith.subf %222, %225 : vector<16x128xf32>
    %227 = math.exp %226 : vector<16x128xf32>
    %cst_77 = arith.constant dense<0.000000e+00> : vector<16xf32>
    %228 = vector.multi_reduction <add>, %227, %cst_77 [1] : vector<16x128xf32> to vector<16xf32>
    %229 = vector.shape_cast %228 : vector<16xf32> to vector<16x1xf32>
    %230 = math.log %229 : vector<16x1xf32>
    %231 = arith.addf %224, %230 : vector<16x1xf32>
    %232 = vector.broadcast %211 : vector<16x1xi32> to vector<16x128xi32>
    %233 = arith.cmpi eq, %129, %232 : vector<16x128xi32>
    %cst_78 = arith.constant 0.000000e+00 : f32
    %234 = vector.broadcast %cst_78 : f32 to vector<16x128xf32>
    %235 = arith.select %233, %128, %234 : vector<16x128xi1>, vector<16x128xf32>
    %cst_79 = arith.constant dense<0.000000e+00> : vector<16xf32>
    %236 = vector.multi_reduction <add>, %235, %cst_79 [1] : vector<16x128xf32> to vector<16xf32>
    %237 = vector.shape_cast %236 : vector<16xf32> to vector<16x1xf32>
    %238 = arith.subf %231, %237 : vector<16x1xf32>
    %239 = arith.mulf %238, %215 : vector<16x1xf32>
    %240 = vector.shape_cast %239 : vector<16x1xf32> to vector<1x16x1xf32>
    %cst_80 = arith.constant dense<0.000000e+00> : vector<1xf32>
    %241 = vector.multi_reduction <add>, %240, %cst_80 [1, 2] : vector<1x16x1xf32> to vector<1xf32>
    %242 = vector.shape_cast %241 : vector<1xf32> to vector<1x1x1xf32>
    %243 = vector.extract %242[0, 0, 0] : f32 from vector<1x1x1xf32>
    %244 = vector.shape_cast %215 : vector<16x1xf32> to vector<1x16x1xf32>
    %cst_81 = arith.constant dense<0.000000e+00> : vector<1xf32>
    %245 = vector.multi_reduction <add>, %244, %cst_81 [1, 2] : vector<1x16x1xf32> to vector<1xf32>
    %246 = vector.shape_cast %245 : vector<1xf32> to vector<1x1x1xf32>
    %247 = vector.extract %246[0, 0, 0] : f32 from vector<1x1x1xf32>
    %cst_82 = arith.constant 1.000000e+00 : f32
    %248 = arith.maximumf %247, %cst_82 : f32
    %249 = arith.divf %243, %248 : f32
    %250 = arith.addf %210, %249 : f32
    %c0_83 = arith.constant 0 : index
    %251 = memref.load %arg5[%c0_83] : memref<1xf32, #tpu.memory_space<smem>>
    memref.store %250, %arg5[%c0_83] : memref<1xf32, #tpu.memory_space<smem>>
    return
  }
}

</mosaic_0001>

<bundles_post_ra>
// kernel: eq.11
= control target key start
LH: loop header
LB: loop body
LE: loop exit
PB: predicated region body
PF: predicated region fallthrough
CT: control target
= control target key end

     0   :  { %vm8_vm0 = vcmask 64512   ;;  %vm14_vm1 = vcmask 130112   ;;  %s42_s0 = inlined_call_operand.vmem [shape: s32[2,8], index: 0, kind: input, shape index: {}]   ;;  %s43_s1 = inlined_call_operand.vmem [shape: s32[16], index: 1, kind: output, shape index: {}]  }
   0x1   :  { %v5_v0 = vld [vmem:[%s42_s0] sm:$0x3]  ;;  %s25_s0 = smov 8  }
   0x2   :  { %6 = vst [vmem:[#allocation1] sm:$0x3] %v5_v0 }
   0x9   :  { %v11_v1 = vld [vmem:[#allocation1 + $0x1] sm:$0x1]   ;;  %v7_v2 = vld [vmem:[#allocation1] sm:$0x1]  }
   0xa   :  { %12 = vrot.lane.b32.xlu0 %v11_v1, %s25_s0  ;;  %9 = vst.msk [vmem:[#allocation0] sm:$0x1] %vm8_vm0, %v7_v2  }
  0x7c   :  { %v13_v3 = vpop.permute.xlu0 %12  }
  0x7d   :  { %15 = vst.msk [vmem:[#allocation0] sm:$0x1] %vm14_vm1, %v13_v3  }
  0x84   :  { %v20_v4 = vld [vmem:[#allocation0] sm:$0x1] }
  0x85   :  { %23 = vst [vmem:[%s43_s1] sm:$0x1] %v20_v4 }

// kernel: model_forward.1
= control target key start
LH: loop header
LB: loop body
LE: loop exit
PB: predicated region body
PF: predicated region fallthrough
CT: control target
= control target key end

     0   :  { %vm36_vm0 = vcmask 523264   ;;  %s4212_s0 = inlined_call_operand.vmem [shape: f32[16,64], index: 0, kind: input, shape index: {}]   ;;  %s4213_s1 = inlined_call_operand.vmem [shape: f32[16,16], index: 1, kind: input, shape index: {}]   ;;  %s4214_s2 = inlined_call_operand.vmem [shape: s32[16,3], index: 2, kind: input, shape index: {}]   ;;  %s4215_s3 = inlined_call_operand.vmem [shape: f32[320,128], index: 3, kind: input, shape index: {}]   ;;  %s4216_s4 = inlined_call_operand.vmem [shape: f32[11,128], index: 4, kind: input, shape index: {}]   ;;  %s4217_s5 = inlined_call_operand.hbm [shape: f32[1], index: 5, kind: output, shape index: {}]  }
   0x1   :  { %v30_v0 = vld [vmem:[%s4215_s3 + $0x38] sm:$0xff]  ;;  %v29_v1 = vld [vmem:[%s4215_s3 + $0x30] sm:$0xff]  ;;  %v28_v2 = vld [vmem:[%s4215_s3 + $0x28] sm:$0xff] }
   0x2   :  { %3232 = vmatprep.subr.mxu0 %v30_v0  ;;  %v21_v3 = vld [vmem:[%s4212_s0] sm:$0xff]  ;;  %v123_v4 = vld [vmem:[%s4215_s3 + $0x58] sm:$0xff] }
   0x3   :  { %3233 = vmatpush3.msra.mxu0 %v30_v0  ;;  %3248 = vmatprep.mubr.msk.f32.mxu0 %vm36_vm0, %v21_v3 }
   0x4   :  { %3234 = vmatprep.subr.mxu0 %v29_v1 }
   0x5   :  { %10 = vsyncpa [#allocation3], 0  ;;  %3235 = vmatpush3.msra.mxu0 %v29_v1  ;;  %v27_v5 = vld [vmem:[%s4215_s3 + $0x20] sm:$0xff]  ;;  %3251 = vmatprep.subr.mxu1 %v123_v4  ;;  %v26_v6 = vld [vmem:[%s4215_s3 + $0x18] sm:$0xff]  ;;  %vm129_vm1 = vcmask 261120   ;;  %s3525_s15 = smov 120   ;;  %v404_v41 = vlaneseq }
   0x6   :  { %3236 = vmatprep.subr.mxu0 %v28_v2  ;;  %3252 = vmatpush3.msra.mxu1 %v123_v4  ;;  %v25_v7 = vld [vmem:[%s4215_s3 + $0x10] sm:$0xff]  ;;  %v24_v8 = vld [vmem:[%s4215_s3 + $0x8] sm:$0xff]  ;;  %v23_v9 = vld [vmem:[%s4215_s3] sm:$0xff]  ;;  %s3526_s18 = smov 112   ;;  %s3527_s19 = smov 104   ;;  %vm1255_vm2 = vcmask 64512  }
   0x7   :  { %3237 = vmatpush3.msra.mxu0 %v28_v2  ;;  %v22_v10 = vld [vmem:[%s4212_s0 + $0x8] sm:$0xff]  ;;  %v298_v11 = vld [vmem:[%s4215_s3 + $0x98] sm:$0xff]  ;;  %v122_v12 = vld [vmem:[%s4215_s3 + $0x50] sm:$0xff]  ;;  %v3528_v39 = vmov 1983009808   ;;  %v405_v46 = vshrl.u32 %v404_v41, 7 }
   0x8   :  { %3238 = vmatprep.subr.mxu0 %v27_v5  ;;  %3253 = vmatprep.subr.mxu1 %v122_v12  ;;  %v297_v13 = vld [vmem:[%s4215_s3 + $0x90] sm:$0xff]  ;;  %v121_v14 = vld [vmem:[%s4215_s3 + $0x48] sm:$0xff]  ;;  %v120_v16 = vld [vmem:[%s4215_s3 + $0x40] sm:$0xff]  ;;  %v402_v40 = vunpack.c.l.s4 %v3528_v39  ;;  %v3529_v43 = vmov 1934713408   ;;  %vm1622_vm3 = vcmask 130048  }
   0x9   :  { %3239 = vmatpush3.msra.mxu0 %v27_v5  ;;  %3254 = vmatpush3.msra.mxu1 %v122_v12  ;;  %v296_v15 = vld [vmem:[%s4215_s3 + $0x88] sm:$0xff]  ;;  %v295_v17 = vld [vmem:[%s4215_s3 + $0x80] sm:$0xff]  ;;  %v214_v18 = vld [vmem:[%s4215_s3 + $0x78] sm:$0xff]  ;;  %v434_v44 = vunpack.c.l.s4 %v3529_v43  ;;  %s3530_s7 = smov 16   ;;  %s3531_s8 = smov 8   ;;  %vm2335_vm4 = vcmask 195584  }
   0xa   :  { %3240 = vmatprep.subr.mxu0 %v26_v6  ;;  %3255 = vmatprep.subr.mxu1 %v121_v14  ;;  %v3075_v19 = vld [vmem:[%s4216_s4] ss:$0 sm:$0xff]  ;;  %v213_v26 = vld [vmem:[%s4215_s3 + $0x70] sm:$0xff]  ;;  %v212_v27 = vld [vmem:[%s4215_s3 + $0x68] sm:$0xff]  ;;  %v403_v45 = vunpack.c.0.s8 %v402_v40  ;;  %s3532_s9 = smov 24   ;;  %s3538_s29 = smov 126  }
   0xb   :  { %3241 = vmatpush3.msra.mxu0 %v26_v6  ;;  %3256 = vmatpush3.msra.mxu1 %v121_v14  ;;  %v211_v28 = vld [vmem:[%s4215_s3 + $0x60] sm:$0xff]  ;;  %v435_v49 = vunpack.c.0.s8 %v434_v44  ;;  %s3540_s22 = smov [#allocation2]  }
   0xc   :  { %3242 = vmatprep.subr.mxu0 %v25_v7  ;;  %3257 = vmatprep.subr.mxu1 %v120_v16  ;;  %v3078_v29 = vld [vmem:[%s4216_s4 + $0x1] ss:$0 sm:$0xff]  ;;  %v3081_v34 = vld [vmem:[%s4216_s4 + $0x2] ss:$0 sm:$0xff]  ;;  %v3694_v50 = vsub.s32 %v403_v45, %v405_v46 }
   0xd   :  { %3243 = vmatpush3.msra.mxu0 %v25_v7  ;;  %3258 = vmatpush3.msra.mxu1 %v120_v16  ;;  %v3696_v56 = vsub.s32 %v435_v49, %v405_v46 }
   0xe   :  { %3244 = vmatprep.subr.mxu0 %v24_v8  ;;  %3262 = vmatprep.subr.mxu1 %v214_v18 }
   0xf   :  { %3245 = vmatpush3.msra.mxu0 %v24_v8 }
  0x10   :  { %3246 = vmatprep.subr.mxu0 %v23_v9 }
  0x11   :  { %3247 = vmatpush3.msra.mxu0 %v23_v9 }
  0x12   :  { %3249 = vmatmul.mubr.msk.f32.vlgmr.msra.gmra.mxu0 %vm36_vm0, %v22_v10  ;;  %3273 = vmatprep.subr.mxu0 %v298_v11 }
  0x13   :  { %3274 = vmatpush3.msra.mxu0 %v298_v11 }
  0x14   :  { %3275 = vmatprep.subr.mxu0 %v297_v13 }
  0x15   :  { %3276 = vmatpush3.msra.mxu0 %v297_v13 }
  0x16   :  { %3277 = vmatprep.subr.mxu0 %v296_v15 }
  0x17   :  { %3278 = vmatpush3.msra.mxu0 %v296_v15 }
  0x18   :  { %3279 = vmatprep.subr.mxu0 %v295_v17 }
  0x19   :  { %3280 = vmatpush3.msra.mxu0 %v295_v17 }
  0xd2   :  { %v3250_v20 = vpop.f32.mrf.mxu0 }
  0xd3   :  { %v115_v21 = vadd.f32 %v3250_v20, %v3075_v19 }
  0xd4   :  { %v109_v22 = vpop.f32.mrf.mxu0 }
  0xd5   :  { %v110_v23 = vadd.f32 %v3075_v19, %v109_v22  ;;  %v3635_v25 = vmax.f32 %v115_v21, 0.0 }
  0xd7   :  { %v3633_v24 = vmax.f32 %v110_v23, 0.0 }
  0xd9   :  { %3259 = vmatprep.mubr.msk.f32.mxu1 %vm129_vm1, %v3633_v24  ;;  %3281 = vmatprep.mubr.msk.f32.mxu0 %vm129_vm1, %v3633_v24 }
  0xda   :  { %3260 = vmatmul.mubr.msk.f32.vlgmr.msra.gmra.mxu1 %vm129_vm1, %v3635_v25  ;;  %3282 = vmatmul.mubr.msk.f32.vlgmr.msra.gmra.mxu0 %vm129_vm1, %v3635_v25 }
  0xdb   :  { %3263 = vmatpush3.msra.mxu1 %v214_v18  ;;  %3270 = vmatprep.mubr.msk.f32.mxu1 %vm129_vm1, %v3633_v24 }
  0xdc   :  { %3264 = vmatprep.subr.mxu1 %v213_v26 }
  0xdd   :  { %3265 = vmatpush3.msra.mxu1 %v213_v26 }
  0xde   :  { %3266 = vmatprep.subr.mxu1 %v212_v27 }
  0xdf   :  { %3267 = vmatpush3.msra.mxu1 %v212_v27 }
  0xe0   :  { %3268 = vmatprep.subr.mxu1 %v211_v28 }
  0xe1   :  { %3269 = vmatpush3.msra.mxu1 %v211_v28 }
  0xe2   :  { %3271 = vmatmul.mubr.msk.f32.vlgmr.msra.gmra.mxu1 %vm129_vm1, %v3635_v25 }
 0x19a   :  { %v3261_v30 = vpop.f32.mrf.mxu1 }
 0x19b   :  { %v3661_v31 = vadd.f32 %v3261_v30, %v3078_v29 }
 0x19c   :  { %v202_v32 = vpop.f32.mrf.mxu1 }
 0x19d   :  { %v203_v33 = vadd.f32 %v3078_v29, %v202_v32  ;;  %383 = vrot.lane.b32.xlu1 %v3661_v31, %s3525_s15 }
 0x19f   :  { %381 = vrot.lane.b32.xlu0 %v203_v33, %s3525_s15 }
 0x1a1   :  { %387 = vrot.lane.b32.xlu1 %v203_v33, %s3526_s18 }
 0x1a2   :  { %v3272_v35 = vpop.f32.mrf.mxu1 }
 0x1a3   :  { %v3670_v36 = vadd.f32 %v3272_v35, %v3081_v34  ;;  %393 = vrot.lane.b32.xlu0 %v203_v33, %s3527_s19 }
 0x1a4   :  { %v286_v37 = vpop.f32.mrf.mxu1 }
 0x1a5   :  { %687 = vrot.lane.b32.xlu1 %v3670_v36, %s3527_s19  ;;  %v3675_v38 = vadd.f32 %v3081_v34, %v286_v37 }
 0x1a7   :  { %675 = vrot.lane.b32.xlu0 %v3670_v36, %s3525_s15 }
 0x1a9   :  { %673 = vrot.lane.b32.xlu1 %v3675_v38, %s3525_s15 }
 0x1ab   :  { %681 = vrot.lane.b32.xlu0 %v3670_v36, %s3526_s18 }
 0x1ad   :  { %685 = vrot.lane.b32.xlu1 %v3675_v38, %s3527_s19 }
 0x1af   :  { %679 = vrot.lane.b32.xlu0 %v3675_v38, %s3526_s18 }
 0x1b1   :  { %395 = vrot.lane.b32.xlu1 %v3661_v31, %s3527_s19 }
 0x1b3   :  { %389 = vrot.lane.b32.xlu0 %v3661_v31, %s3526_s18 }
 0x20f   :  { %v3691_v42 = vpop.permute.xlu1 %383 }
 0x211   :  { %v382_v47 = vpop.permute.xlu0 %381 }
 0x213   :  { %v388_v48 = vpop.permute.xlu1 %387 }
 0x214   :  { %v399_v51 = vcombine.low %v203_v33, %v388_v48  ;;  %v400_v52 = vcombine.high %v203_v33, %v388_v48 }
 0x215   :  { %v394_v53 = vpop.permute.xlu0 %393 }
 0x216   :  { %v415_v54 = vcombine.low %v382_v47, %v394_v53  ;;  %v416_v55 = vcombine.high %v382_v47, %v394_v53  ;;  %v407_v58 = vrot.slane %v399_v51, %v3694_v50  ;;  %v414_v59 = vrot.slane %v400_v52, %v3694_v50 }
 0x217   :  { %v688_v57 = vpop.permute.xlu1 %687 }
 0x218   :  { %v423_v60 = vrot.slane %v415_v54, %v3694_v50  ;;  %v430_v61 = vrot.slane %v416_v55, %v3694_v50 }
 0x219   :  { %v676_v62 = vpop.permute.xlu0 %675 }
 0x21a   :  { %v431_v63 = vcombine.low %v407_v58, %v423_v60  ;;  %v432_v0 = vcombine.high %v407_v58, %v423_v60  ;;  %v447_v1 = vcombine.low %v414_v59, %v430_v61  ;;  %v448_v2 = vcombine.high %v414_v59, %v430_v61 }
 0x21b   :  { %v775_v3 = vcombine.low %v676_v62, %v688_v57  ;;  %v776_v4 = vcombine.high %v676_v62, %v688_v57  ;;  %v674_v5 = vpop.permute.xlu1 %673 }
 0x21c   :  { %v439_v6 = vrot.slane %v431_v63, %v3696_v56  ;;  %v446_v7 = vrot.slane %v432_v0, %v3696_v56  ;;  %v455_v8 = vrot.slane %v447_v1, %v3696_v56  ;;  %v462_v9 = vrot.slane %v448_v2, %v3696_v56 }
 0x21d   :  { %v682_v10 = vpop.permute.xlu0 %681  ;;  %v783_v15 = vrot.slane %v775_v3, %v3694_v50  ;;  %v790_v16 = vrot.slane %v776_v4, %v3694_v50 }
 0x21e   :  { %v535_v11 = vcombine.low %v439_v6, %v446_v7  ;;  %v3087_v12 = vcombine.high %v439_v6, %v446_v7  ;;  %v551_v13 = vcombine.low %v455_v8, %v462_v9  ;;  %v3088_v14 = vcombine.high %v455_v8, %v462_v9 }
 0x21f   :  { %v759_v17 = vcombine.low %v3670_v36, %v682_v10  ;;  %v760_v18 = vcombine.high %v3670_v36, %v682_v10  ;;  %v686_v19 = vpop.permute.xlu1 %685 }
 0x220   :  { %v3711_v20 = vrot.slane %v535_v11, %v3694_v50  ;;  %v3714_v21 = vrot.slane %v3087_v12, %v3694_v50  ;;  %v3717_v22 = vrot.slane %v551_v13, %v3694_v50  ;;  %v3720_v23 = vrot.slane %v3088_v14, %v3694_v50 }
 0x221   :  { %v767_v26 = vrot.slane %v759_v17, %v3694_v50  ;;  %v774_v27 = vrot.slane %v760_v18, %v3694_v50  ;;  %v707_v28 = vcombine.low %v674_v5, %v686_v19  ;;  %v708_v29 = vcombine.high %v674_v5, %v686_v19  ;;  %v680_v30 = vpop.permute.xlu0 %679 }
 0x222   :  { %v691_v32 = vcombine.low %v3675_v38, %v680_v30  ;;  %v692_v33 = vcombine.high %v3675_v38, %v680_v30  ;;  %v567_v34 = vcombine.low %v3711_v20, %v3714_v21  ;;  %v583_v35 = vcombine.low %v3717_v22, %v3720_v23 }
 0x223   :  { %v791_v36 = vcombine.low %v767_v26, %v783_v15  ;;  %v792_v37 = vcombine.high %v767_v26, %v783_v15  ;;  %v807_v39 = vcombine.low %v774_v27, %v790_v16  ;;  %v808_v40 = vcombine.high %v774_v27, %v790_v16  ;;  %v396_v0 = vpop.permute.xlu1 %395 }
 0x224   :  { %v715_v43 = vrot.slane %v707_v28, %v3694_v50  ;;  %v722_v44 = vrot.slane %v708_v29, %v3694_v50  ;;  %v699_v45 = vrot.slane %v691_v32, %v3694_v50  ;;  %v706_v46 = vrot.slane %v692_v33, %v3694_v50 }
 0x225   :  { %v799_v38 = vrot.slane %v791_v36, %v3696_v56  ;;  %v806_v47 = vrot.slane %v792_v37, %v3696_v56  ;;  %v815_v48 = vrot.slane %v807_v39, %v3696_v56  ;;  %v822_v49 = vrot.slane %v808_v40, %v3696_v56  ;;  %v390_v1 = vpop.permute.xlu0 %389 }
 0x226   :  { %v723_v51 = vcombine.low %v699_v45, %v715_v43  ;;  %v724_v52 = vcombine.high %v699_v45, %v715_v43  ;;  %v739_v53 = vcombine.low %v706_v46, %v722_v44  ;;  %v740_v54 = vcombine.high %v706_v46, %v722_v44 }
 0x227   :  { %v895_v55 = vcombine.low %v799_v38, %v806_v47  ;;  %v3093_v57 = vcombine.high %v799_v38, %v806_v47  ;;  %v911_v58 = vcombine.low %v815_v48, %v822_v49  ;;  %v3094_v59 = vcombine.high %v815_v48, %v822_v49 }
 0x228   :  { %v731_v60 = vrot.slane %v723_v51, %v3696_v56  ;;  %v738_v61 = vrot.slane %v724_v52, %v3696_v56  ;;  %v747_v62 = vrot.slane %v739_v53, %v3696_v56  ;;  %v754_v63 = vrot.slane %v740_v54, %v3696_v56 }
 0x229   :  { %v902_v2 = vrot.slane %v895_v55, %v3694_v50  ;;  %v910_v3 = vrot.slane %v3093_v57, %v3694_v50  ;;  %v3745_v4 = vrot.slane %v911_v58, %v3694_v50  ;;  %v3748_v5 = vrot.slane %v3094_v59, %v3694_v50 }
 0x22a   :  { %v827_v6 = vcombine.low %v731_v60, %v738_v61  ;;  %v3091_v7 = vcombine.high %v731_v60, %v738_v61  ;;  %v843_v8 = vcombine.low %v747_v62, %v754_v63  ;;  %v3092_v9 = vcombine.high %v747_v62, %v754_v63 }
 0x22b   :  { %v483_v10 = vcombine.low %v3691_v42, %v396_v0  ;;  %v484_v11 = vcombine.high %v3691_v42, %v396_v0  ;;  %v467_v12 = vcombine.low %v3661_v31, %v390_v1  ;;  %v468_v13 = vcombine.high %v3661_v31, %v390_v1 }
 0x22c   :  { %v3755_v14 = vrot.slane %v827_v6, %v3694_v50  ;;  %v3758_v15 = vrot.slane %v3091_v7, %v3694_v50  ;;  %v3761_v16 = vrot.slane %v843_v8, %v3694_v50  ;;  %v3764_v17 = vrot.slane %v3092_v9, %v3694_v50 }
 0x22d   :  { %v491_v18 = vrot.slane %v483_v10, %v3694_v50  ;;  %v498_v42 = vrot.slane %v484_v11, %v3694_v50  ;;  %v475_v19 = vrot.slane %v467_v12, %v3694_v50  ;;  %v482_v31 = vrot.slane %v468_v13, %v3694_v50 }
 0x22e   :  { %v575_v26 = vrot.slane %v567_v34, %v3696_v56  ;;  %v591_v27 = vrot.slane %v583_v35, %v3696_v56  ;;  %v927_v28 = vcombine.low %v902_v2, %v910_v3  ;;  %v943_v29 = vcombine.low %v3745_v4, %v3748_v5 }
 0x22f   :  { %v499_v30 = vcombine.low %v475_v19, %v491_v18  ;;  %v500_v32 = vcombine.high %v475_v19, %v491_v18  ;;  %v515_v33 = vcombine.low %v482_v31, %v498_v42  ;;  %v516_v36 = vcombine.high %v482_v31, %v498_v42 }
 0x230   :  { %v599_v37 = vcombine.low %v575_v26, %v591_v27  ;;  %v600_v39 = vcombine.high %v575_v26, %v591_v27  ;;  %v935_v40 = vrot.slane %v927_v28, %v3696_v56  ;;  %v951_v43 = vrot.slane %v943_v29, %v3696_v56  ;;  %v3283_v29 = vpop.f32.mrf.mxu0 }
 0x231   :  { %v507_v44 = vrot.slane %v499_v30, %v3696_v56  ;;  %v514_v34 = vrot.slane %v500_v32, %v3696_v56  ;;  %v523_v35 = vrot.slane %v515_v33, %v3696_v56  ;;  %v530_v45 = vrot.slane %v516_v36, %v3696_v56  ;;  %v1613_v36 = vld [vmem:[%s4213_s1 + $0x8] sm:$0xff] }
 0x232   :  { %3288 = vmatprep.mubr.msk.f32.mxu1 %vm1255_vm2, %v599_v37  ;;  %3295 = vmatprep.mubr.msk.f32.mxu0 %vm1255_vm2, %v600_v39  ;;  %v959_v46 = vcombine.low %v935_v40, %v951_v43  ;;  %v960_v38 = vcombine.high %v935_v40, %v951_v43  ;;  %v859_v47 = vcombine.low %v3755_v14, %v3758_v15  ;;  %v370_v30 = vpop.f32.mrf.mxu0  ;;  %v1612_v43 = vld [vmem:[%s4213_s1] sm:$0xff] }
 0x233   :  { %v603_v48 = vcombine.low %v507_v44, %v514_v34  ;;  %v3089_v49 = vcombine.high %v507_v44, %v514_v34  ;;  %v619_v51 = vcombine.low %v523_v35, %v530_v45  ;;  %v3090_v52 = vcombine.high %v523_v35, %v530_v45 }
 0x234   :  { %3284 = vmatprep.subr.msk.mxu1 %vm1255_vm2, %v959_v46  ;;  %3291 = vmatprep.subr.msk.mxu0 %vm1255_vm2, %v960_v38  ;;  %v867_v53 = vrot.slane %v859_v47, %v3696_v56  ;;  %v875_v54 = vcombine.low %v3761_v16, %v3764_v17  ;;  %v928_v55 = vcombine.high %v902_v2, %v910_v3 }
 0x235   :  { %v610_v57 = vrot.slane %v603_v48, %v3694_v50  ;;  %v618_v58 = vrot.slane %v3089_v49, %v3694_v50  ;;  %v626_v59 = vrot.slane %v619_v51, %v3694_v50  ;;  %v634_v60 = vrot.slane %v3090_v52, %v3694_v50  ;;  %3285 = vmatpush3.xpose.msk.msra.mxu1 %vm1255_vm2, %v959_v46 }
 0x236   :  { %3292 = vmatpush3.xpose.msk.msra.mxu0 %vm1255_vm2, %v960_v38  ;;  %v883_v61 = vrot.slane %v875_v54, %v3696_v56  ;;  %v942_v62 = vrot.slane %v928_v55, %v3696_v56  ;;  %v944_v63 = vcombine.high %v3745_v4, %v3748_v5  ;;  %v568_v0 = vcombine.high %v3711_v20, %v3714_v21 }
 0x237   :  { %v635_v1 = vcombine.low %v610_v57, %v618_v58  ;;  %v636_v2 = vcombine.high %v610_v57, %v618_v58  ;;  %v651_v3 = vcombine.low %v626_v59, %v634_v60  ;;  %v584_v12 = vcombine.high %v3717_v22, %v3720_v23 }
 0x238   :  { %v891_v6 = vcombine.low %v867_v53, %v883_v61  ;;  %v892_v7 = vcombine.high %v867_v53, %v883_v61  ;;  %v958_v8 = vrot.slane %v944_v63, %v3696_v56  ;;  %v582_v9 = vrot.slane %v568_v0, %v3696_v56 }
 0x239   :  { %v643_v10 = vrot.slane %v635_v1, %v3696_v56  ;;  %v659_v11 = vrot.slane %v651_v3, %v3696_v56  ;;  %v860_v4 = vcombine.high %v3755_v14, %v3758_v15  ;;  %v876_v5 = vcombine.high %v3761_v16, %v3764_v17 }
 0x23a   :  { %3286 = vmatprep.subr.msk.mxu1 %vm1255_vm2, %v891_v6  ;;  %3293 = vmatprep.subr.msk.mxu0 %vm1255_vm2, %v892_v7  ;;  %v961_v20 = vcombine.low %v942_v62, %v958_v8  ;;  %v962_v21 = vcombine.high %v942_v62, %v958_v8  ;;  %v598_v22 = vrot.slane %v584_v12, %v3696_v56  ;;  %v3084_v8 = vld [vmem:[%s4216_s4 + $0x3] ss:$0 sm:$0xff] }
 0x23b   :  { %3287 = vmatpush3.xpose.msk.msra.mxu1 %vm1255_vm2, %v891_v6  ;;  %3294 = vmatpush3.xpose.msk.msra.mxu0 %vm1255_vm2, %v892_v7  ;;  %v667_v13 = vcombine.low %v643_v10, %v659_v11  ;;  %v668_v18 = vcombine.high %v643_v10, %v659_v11  ;;  %v652_v23 = vcombine.high %v626_v59, %v634_v60 }
 0x23c   :  { %3298 = vmatprep.subr.msk.mxu1 %vm1255_vm2, %v961_v20  ;;  %3305 = vmatprep.subr.msk.mxu0 %vm1255_vm2, %v962_v21  ;;  %v874_v14 = vrot.slane %v860_v4, %v3696_v56  ;;  %v890_v15 = vrot.slane %v876_v5, %v3696_v56  ;;  %v601_v42 = vcombine.low %v582_v9, %v598_v22 }
 0x23d   :  { %v602_v16 = vcombine.high %v582_v9, %v598_v22  ;;  %v650_v31 = vrot.slane %v636_v2, %v3696_v56  ;;  %v666_v26 = vrot.slane %v652_v23, %v3696_v56  ;;  %v376_v9 = vadd.f32 %v3283_v29, %v3084_v8 }
 0x23e   :  { %3289 = vmatmul.mubr.msk.f32.vlgmr.msra.gmra.mxu1 %vm1255_vm2, %v667_v13  ;;  %3296 = vmatmul.mubr.msk.f32.vlgmr.msra.gmra.mxu0 %vm1255_vm2, %v668_v18  ;;  %v893_v17 = vcombine.low %v874_v14, %v890_v15  ;;  %v894_v19 = vcombine.high %v874_v14, %v890_v15  ;;  %v3854_v10 = vadd.f32 %v3084_v8, %v370_v30 }
 0x23f   :  { %3299 = vmatpush3.xpose.msk.msra.mxu1 %vm1255_vm2, %v961_v20  ;;  %3302 = vmatprep.mubr.msk.f32.mxu1 %vm1255_vm2, %v601_v42  ;;  %v669_v27 = vcombine.low %v650_v31, %v666_v26  ;;  %v670_v28 = vcombine.high %v650_v31, %v666_v26 }
 0x240   :  { %3306 = vmatpush3.xpose.msk.msra.mxu0 %vm1255_vm2, %v962_v21  ;;  %3309 = vmatprep.mubr.msk.f32.mxu0 %vm1255_vm2, %v602_v16 }
 0x241   :  { %3300 = vmatprep.subr.msk.mxu1 %vm1255_vm2, %v893_v17  ;;  %3307 = vmatprep.subr.msk.mxu0 %vm1255_vm2, %v894_v19 }
 0x243   :  { %3301 = vmatpush3.xpose.msk.msra.mxu1 %vm1255_vm2, %v893_v17 }
 0x244   :  { %3308 = vmatpush3.xpose.msk.msra.mxu0 %vm1255_vm2, %v894_v19 }
 0x246   :  { %3303 = vmatmul.mubr.msk.f32.vlgmr.msra.gmra.mxu1 %vm1255_vm2, %v669_v27 }
 0x247   :  { %3310 = vmatmul.mubr.msk.f32.vlgmr.msra.gmra.mxu0 %vm1255_vm2, %v670_v28 }
 0x2fe   :  { %v3290_v32 = vpop.f32.mrf.mxu1  ;;  %v3297_v33 = vpop.f32.mrf.mxu0 }
 0x2ff   :  { %v1605_v37 = vmul.f32 0.35355338, %v3290_v32  ;;  %v1607_v38 = vmul.f32 0.35355338, %v3297_v33 }
 0x300   :  { %v1334_v39 = vpop.f32.mrf.mxu1  ;;  %v1421_v40 = vpop.f32.mrf.mxu0 }
 0x301   :  { %v1604_v44 = vmul.f32 0.35355338, %v1334_v39  ;;  %v1606_v34 = vmul.f32 0.35355338, %v1421_v40  ;;  %v1615_v35 = vadd.f32 %v1613_v36, %v1605_v37  ;;  %v1617_v53 = vadd.f32 %v1613_v36, %v1607_v38 }
 0x303   :  { %v1626_v45 = vsel %vm1622_vm3, %v1615_v35, -inf  ;;  %v1614_v46 = vadd.f32 %v1612_v43, %v1604_v44  ;;  %v1616_v48 = vadd.f32 %v1612_v43, %v1606_v34  ;;  %v1632_v61 = vsel %vm1622_vm3, %v1617_v53, -inf }
 0x304   :  { %1627 = vmax.xlane.f32.xlu1 %v1626_v45 }
 0x305   :  { %v1623_v47 = vsel %vm1622_vm3, %v1614_v46, -inf  ;;  %v1629_v58 = vsel %vm1622_vm3, %v1616_v48, -inf }
 0x306   :  { %1624 = vmax.xlane.f32.xlu0 %v1623_v47  ;;  %v3304_v49 = vpop.f32.mrf.mxu1 }
 0x307   :  { %v3311_v51 = vpop.f32.mrf.mxu0  ;;  %v1609_v54 = vmul.f32 0.35355338, %v3304_v49 }
 0x308   :  { %v1508_v52 = vpop.f32.mrf.mxu1  ;;  %v1611_v62 = vmul.f32 0.35355338, %v3311_v51 }
 0x309   :  { %v1608_v55 = vmul.f32 0.35355338, %v1508_v52  ;;  %v1595_v57 = vpop.f32.mrf.mxu0  ;;  %v1619_v0 = vadd.f32 %v1613_v36, %v1609_v54 }
 0x30a   :  { %v1610_v59 = vmul.f32 0.35355338, %v1595_v57  ;;  %1630 = vmax.xlane.f32.xlu0 %v1629_v58  ;;  %v1621_v6 = vadd.f32 %v1613_v36, %v1611_v62 }
 0x30b   :  { %v1618_v60 = vadd.f32 %v1612_v43, %v1608_v55  ;;  %v1638_v2 = vsel %vm1622_vm3, %v1619_v0, -inf }
 0x30c   :  { %v1620_v1 = vadd.f32 %v1612_v43, %v1610_v59  ;;  %v1644_v7 = vsel %vm1622_vm3, %v1621_v6, -inf }
 0x30d   :  { %v1635_v63 = vsel %vm1622_vm3, %v1618_v60, -inf }
 0x30e   :  { %1633 = vmax.xlane.f32.xlu0 %v1632_v61  ;;  %1636 = vmax.xlane.f32.xlu1 %v1635_v63  ;;  %v1641_v3 = vsel %vm1622_vm3, %v1620_v1, -inf }
 0x312   :  { %1639 = vmax.xlane.f32.xlu0 %v1638_v2  ;;  %1642 = vmax.xlane.f32.xlu1 %v1641_v3 }
 0x316   :  { %1645 = vmax.xlane.f32.xlu0 %v1644_v7 }
 0x323   :  { %967 = vrot.lane.b32.xlu1 %v376_v9, %s3525_s15 }
 0x327   :  { %979 = vrot.lane.b32.xlu1 %v376_v9, %s3527_s19 }
 0x32c   :  { %973 = vrot.lane.b32.xlu0 %v376_v9, %s3526_s18 }
 0x330   :  { %965 = vrot.lane.b32.xlu0 %v3854_v10, %s3525_s15 }
 0x334   :  { %971 = vrot.lane.b32.xlu0 %v3854_v10, %s3526_s18 }
 0x338   :  { %977 = vrot.lane.b32.xlu0 %v3854_v10, %s3527_s19 }
 0x38d   :  { %v1628_v11 = vpop.xlane.xlu1 %1627 }
 0x38e   :  { %v1648_v12 = vsub.f32 %v1615_v35, %v1628_v11 }
 0x38f   :  { %v1625_v4 = vpop.xlane.xlu0 %1624 }
 0x390   :  { %v1657_v20 = vmul.f32 1.442695, %v1648_v12  ;;  %v1647_v21 = vsub.f32 %v1614_v46, %v1625_v4 }
 0x392   :  { %3441 = vpow2.f32 %v1657_v20  ;;  %v1655_v5 = vmul.f32 1.442695, %v1647_v21 }
 0x393   :  { %v1631_v13 = vpop.xlane.xlu0 %1630 }
 0x394   :  { %3443 = vpow2.f32 %v1655_v5  ;;  %v1649_v18 = vsub.f32 %v1616_v48, %v1631_v13 }
 0x396   :  { %v1659_v22 = vmul.f32 1.442695, %v1649_v18 }
 0x397   :  { %v1634_v23 = vpop.xlane.xlu0 %1633  ;;  %v1637_v14 = vpop.xlane.xlu1 %1636 }
 0x398   :  { %3445 = vpow2.f32 %v1659_v22  ;;  %v1650_v15 = vsub.f32 %v1617_v53, %v1634_v23  ;;  %v1651_v42 = vsub.f32 %v1618_v60, %v1637_v14 }
 0x39a   :  { %v1661_v16 = vmul.f32 1.442695, %v1650_v15  ;;  %v1663_v17 = vmul.f32 1.442695, %v1651_v42 }
 0x39b   :  { %v1640_v19 = vpop.xlane.xlu0 %1639  ;;  %v1643_v31 = vpop.xlane.xlu1 %1642 }
 0x39c   :  { %3447 = vpow2.f32 %v1661_v16  ;;  %v1652_v26 = vsub.f32 %v1619_v0, %v1640_v19  ;;  %v1653_v27 = vsub.f32 %v1620_v1, %v1643_v31 }
 0x39d   :  { %3449 = vpow2.f32 %v1663_v17 }
 0x39e   :  { %v1665_v28 = vmul.f32 1.442695, %v1652_v26  ;;  %v1667_v29 = vmul.f32 1.442695, %v1653_v27 }
 0x39f   :  { %v3862_v30 = vpop.eup %3441  ;;  %v1646_v32 = vpop.xlane.xlu0 %1645 }
 0x3a0   :  { %v968_v33 = vpop.permute.xlu1 %967  ;;  %3451 = vpow2.f32 %v1665_v28  ;;  %v1654_v36 = vsub.f32 %v1621_v6, %v1646_v32  ;;  %v1674_v37 = vsel %vm1622_vm3, %v3862_v30, 0.0 }
 0x3a1   :  { %v3866_v39 = vpop.eup %3443  ;;  %3453 = vpow2.f32 %v1667_v29  ;;  %1675 = vadd.xlane.f32.xlu0 %v1674_v37 }
 0x3a2   :  { %v1669_v40 = vmul.f32 1.442695, %v1654_v36  ;;  %v1671_v43 = vsel %vm1622_vm3, %v3866_v39, 0.0 }
 0x3a3   :  { %v974_v44 = vpop.permute.xlu0 %973  ;;  %1672 = vadd.xlane.f32.xlu1 %v1671_v43 }
 0x3a4   :  { %v980_v34 = vpop.permute.xlu1 %979  ;;  %3455 = vpow2.f32 %v1669_v40  ;;  %v1051_v35 = vcombine.low %v376_v9, %v974_v44  ;;  %v1052_v45 = vcombine.high %v376_v9, %v974_v44 }
 0x3a5   :  { %v1067_v46 = vcombine.low %v968_v33, %v980_v34  ;;  %v3870_v38 = vpop.eup %3445  ;;  %v1068_v47 = vcombine.high %v968_v33, %v980_v34 }
 0x3a6   :  { %v1059_v48 = vrot.slane %v1051_v35, %v3694_v50  ;;  %v1066_v49 = vrot.slane %v1052_v45, %v3694_v50  ;;  %v1677_v52 = vsel %vm1622_vm3, %v3870_v38, 0.0 }
 0x3a7   :  { %v1075_v51 = vrot.slane %v1067_v46, %v3694_v50  ;;  %v1082_v53 = vrot.slane %v1068_v47, %v3694_v50  ;;  %v966_v54 = vpop.permute.xlu0 %965  ;;  %1678 = vadd.xlane.f32.xlu1 %v1677_v52 }
 0x3a9   :  { %v1083_v55 = vcombine.low %v1059_v48, %v1075_v51  ;;  %v1084_v57 = vcombine.high %v1059_v48, %v1075_v51  ;;  %v3878_v58 = vpop.eup %3447  ;;  %v1099_v59 = vcombine.low %v1066_v49, %v1082_v53  ;;  %v1100_v60 = vcombine.high %v1066_v49, %v1082_v53 }
 0x3aa   :  { %v3880_v61 = vpop.eup %3449  ;;  %v1680_v0 = vsel %vm1622_vm3, %v3878_v58, 0.0 }
 0x3ab   :  { %v1091_v62 = vrot.slane %v1083_v55, %v3696_v56  ;;  %v1098_v63 = vrot.slane %v1084_v57, %v3696_v56  ;;  %v1107_v1 = vrot.slane %v1099_v59, %v3696_v56  ;;  %v1114_v2 = vrot.slane %v1100_v60, %v3696_v56  ;;  %1681 = vadd.xlane.f32.xlu0 %v1680_v0  ;;  %v972_v3 = vpop.permute.xlu0 %971 }
 0x3ac   :  { %v1683_v6 = vsel %vm1622_vm3, %v3880_v61, 0.0  ;;  %v983_v9 = vcombine.low %v3854_v10, %v972_v3  ;;  %v984_v21 = vcombine.high %v3854_v10, %v972_v3 }
 0x3ad   :  { %v1187_v7 = vcombine.low %v1091_v62, %v1098_v63  ;;  %v3097_v8 = vcombine.high %v1091_v62, %v1098_v63  ;;  %1684 = vadd.xlane.f32.xlu1 %v1683_v6  ;;  %v3891_v11 = vpop.eup %3451  ;;  %v1203_v12 = vcombine.low %v1107_v1, %v1114_v2  ;;  %v3098_v4 = vcombine.high %v1107_v1, %v1114_v2 }
 0x3ae   :  { %v3893_v20 = vpop.eup %3453  ;;  %v1686_v5 = vsel %vm1622_vm3, %v3891_v11, 0.0  ;;  %v991_v42 = vrot.slane %v983_v9, %v3694_v50  ;;  %v998_v28 = vrot.slane %v984_v21, %v3694_v50 }
 0x3af   :  { %v1194_v13 = vrot.slane %v1187_v7, %v3694_v50  ;;  %1687 = vadd.xlane.f32.xlu0 %v1686_v5  ;;  %v978_v18 = vpop.permute.xlu0 %977  ;;  %v1689_v22 = vsel %vm1622_vm3, %v3893_v20, 0.0  ;;  %v1202_v23 = vrot.slane %v3097_v8, %v3694_v50  ;;  %v1210_v14 = vrot.slane %v1203_v12, %v3694_v50 }
 0x3b0   :  { %v1218_v15 = vrot.slane %v3098_v4, %v3694_v50  ;;  %v999_v16 = vcombine.low %v966_v54, %v978_v18  ;;  %v1000_v10 = vcombine.high %v966_v54, %v978_v18 }
 0x3b1   :  { %1690 = vadd.xlane.f32.xlu1 %v1689_v22  ;;  %v3905_v17 = vpop.eup %3455  ;;  %v1219_v19 = vcombine.low %v1194_v13, %v1202_v23  ;;  %v1220_v26 = vcombine.high %v1194_v13, %v1202_v23 }
 0x3b2   :  { %v1235_v31 = vcombine.low %v1210_v14, %v1218_v15  ;;  %v1236_v27 = vcombine.high %v1210_v14, %v1218_v15  ;;  %v1007_v29 = vrot.slane %v999_v16, %v3694_v50  ;;  %v1014_v32 = vrot.slane %v1000_v10, %v3694_v50 }
 0x3b3   :  { %v1692_v33 = vsel %vm1622_vm3, %v3905_v17, 0.0  ;;  %v1227_v36 = vrot.slane %v1219_v19, %v3696_v56  ;;  %v1234_v40 = vrot.slane %v1220_v26, %v3696_v56 }
 0x3b4   :  { %v1243_v37 = vrot.slane %v1235_v31, %v3696_v56  ;;  %v1250_v43 = vrot.slane %v1236_v27, %v3696_v56  ;;  %v1015_v44 = vcombine.low %v991_v42, %v1007_v29  ;;  %v1016_v34 = vcombine.high %v991_v42, %v1007_v29 }
 0x3b5   :  { %v1031_v35 = vcombine.low %v998_v28, %v1014_v32  ;;  %v1032_v45 = vcombine.high %v998_v28, %v1014_v32  ;;  %1693 = vadd.xlane.f32.xlu1 %v1692_v33 }
 0x3b6   :  { %v1251_v46 = vcombine.low %v1227_v36, %v1243_v37  ;;  %v3916_v47 = vcombine.low %v1234_v40, %v1250_v43  ;;  %v3918_v48 = vcombine.high %v1234_v40, %v1250_v43  ;;  %v1023_v49 = vrot.slane %v1015_v44, %v3696_v56 }
 0x3b7   :  { %v1030_v51 = vrot.slane %v1016_v34, %v3696_v56  ;;  %v1039_v52 = vrot.slane %v1031_v35, %v3696_v56  ;;  %v1046_v53 = vrot.slane %v1032_v45, %v3696_v56  ;;  %v1252_v18 = vcombine.high %v1227_v36, %v1243_v37 }
 0x3b8   :  { %3312 = vmatprep.subr.mxu1 %v1251_v46 }
 0x3b9   :  { %v1119_v54 = vcombine.low %v1023_v49, %v1030_v51  ;;  %v3095_v55 = vcombine.high %v1023_v49, %v1030_v51  ;;  %v1135_v57 = vcombine.low %v1039_v52, %v1046_v53  ;;  %v3096_v59 = vcombine.high %v1039_v52, %v1046_v53  ;;  %3313 = vmatpush3.msra.mxu1 %v1251_v46 }
 0x3bb   :  { %v1126_v60 = vrot.slane %v1119_v54, %v3694_v50  ;;  %v1134_v62 = vrot.slane %v3095_v55, %v3694_v50  ;;  %v1142_v63 = vrot.slane %v1135_v57, %v3694_v50  ;;  %v1150_v0 = vrot.slane %v3096_v59, %v3694_v50 }
 0x3bd   :  { %v1151_v1 = vcombine.low %v1126_v60, %v1134_v62  ;;  %v1167_v2 = vcombine.low %v1142_v63, %v1150_v0  ;;  %v1152_v3 = vcombine.high %v1126_v60, %v1134_v62  ;;  %v1168_v6 = vcombine.high %v1142_v63, %v1150_v0 }
 0x3bf   :  { %v1159_v7 = vrot.slane %v1151_v1, %v3696_v56  ;;  %v1175_v8 = vrot.slane %v1167_v2, %v3696_v56  ;;  %v1166_v9 = vrot.slane %v1152_v3, %v3696_v56  ;;  %v1182_v12 = vrot.slane %v1168_v6, %v3696_v56 }
 0x3c1   :  { %v1183_v4 = vcombine.low %v1159_v7, %v1175_v8  ;;  %v1184_v21 = vcombine.high %v1159_v7, %v1175_v8  ;;  %v1185_v5 = vcombine.low %v1166_v9, %v1182_v12  ;;  %v1186_v13 = vcombine.high %v1166_v9, %v1182_v12 }
 0x3c3   :  { %3314 = vmatprep.subr.mxu1 %v1183_v4 }
 0x3c4   :  { %3315 = vmatpush3.msra.mxu1 %v1183_v4 }
 0x3c5   :  { %3319 = vmatprep.subr.mxu1 %v1252_v18 }
 0x42a   :  { %v1676_v22 = vpop.xlane.xlu0 %1675 }
 0x42b   :  { %3457 = vrcp.f32 %v1676_v22 }
 0x42c   :  { %v1673_v23 = vpop.xlane.xlu1 %1672 }
 0x42d   :  { %3459 = vrcp.f32 %v1673_v23 }
 0x430   :  { %v1679_v14 = vpop.xlane.xlu1 %1678 }
 0x431   :  { %3461 = vrcp.f32 %v1679_v14 }
 0x434   :  { %v1682_v15 = vpop.xlane.xlu0 %1681 }
 0x435   :  { %3463 = vrcp.f32 %v1682_v15 }
 0x436   :  { %v1685_v42 = vpop.xlane.xlu1 %1684 }
 0x437   :  { %3465 = vrcp.f32 %v1685_v42 }
 0x438   :  { %v1688_v16 = vpop.xlane.xlu0 %1687  ;;  %v3458_v10 = vpop.eup %3457 }
 0x439   :  { %3467 = vrcp.f32 %v1688_v16  ;;  %v1704_v27 = vmul.f32 %v3458_v10, %v3862_v30 }
 0x43a   :  { %v1691_v19 = vpop.xlane.xlu1 %1690  ;;  %v3460_v31 = vpop.eup %3459 }
 0x43b   :  { %3469 = vrcp.f32 %v1691_v19  ;;  %v1703_v26 = vmul.f32 %v3460_v31, %v3866_v39 }
 0x43d   :  { %3316 = vmatprep.mubr.msk.f32.mxu1 %vm1622_vm3, %v1703_v26  ;;  %v2341_v26 = vld [vmem:[%s4215_s3 + $0xb8] sm:$0xff] }
 0x43e   :  { %v1694_v28 = vpop.xlane.xlu1 %1693  ;;  %v3462_v29 = vpop.eup %3461  ;;  %3317 = vmatmul.mubr.msk.f32.vlgmr.msra.gmra.mxu1 %vm1622_vm3, %v1704_v27  ;;  %v2340_v27 = vld [vmem:[%s4215_s3 + $0xb0] sm:$0xff]  ;;  %3340 = vmatprep.subr.mxu0 %v2341_v26 }
 0x43f   :  { %3471 = vrcp.f32 %v1694_v28  ;;  %3320 = vmatpush3.msra.mxu1 %v1252_v18  ;;  %v1705_v32 = vmul.f32 %v3462_v29, %v3870_v38  ;;  %3341 = vmatpush3.msra.mxu0 %v2341_v26 }
 0x440   :  { %3321 = vmatprep.subr.mxu1 %v1184_v21  ;;  %3342 = vmatprep.subr.mxu0 %v2340_v27 }
 0x441   :  { %3322 = vmatpush3.msra.mxu1 %v1184_v21  ;;  %3323 = vmatprep.mubr.msk.f32.mxu1 %vm1622_vm3, %v1705_v32 }
 0x442   :  { %v3464_v33 = vpop.eup %3463  ;;  %3326 = vmatprep.subr.mxu1 %v3916_v47  ;;  %3343 = vmatpush3.msra.mxu0 %v2340_v27 }
 0x443   :  { %v1706_v30 = vmul.f32 %v3464_v33, %v3878_v58 }
 0x444   :  { %v3466_v39 = vpop.eup %3465 }
 0x445   :  { %v1707_v36 = vmul.f32 %v3466_v39, %v3880_v61  ;;  %3324 = vmatmul.mubr.msk.f32.vlgmr.msra.gmra.mxu1 %vm1622_vm3, %v1706_v30 }
 0x446   :  { %v3468_v37 = vpop.eup %3467  ;;  %3327 = vmatpush3.msra.mxu1 %v3916_v47 }
 0x447   :  { %3330 = vmatprep.mubr.msk.f32.mxu1 %vm1622_vm3, %v1707_v36  ;;  %3328 = vmatprep.subr.mxu1 %v1185_v5  ;;  %v1708_v40 = vmul.f32 %v3468_v37, %v3891_v11 }
 0x448   :  { %v3470_v38 = vpop.eup %3469  ;;  %3329 = vmatpush3.msra.mxu1 %v1185_v5 }
 0x449   :  { %v1709_v43 = vmul.f32 %v3470_v38, %v3893_v20  ;;  %3333 = vmatprep.subr.mxu1 %v3918_v48  ;;  %3331 = vmatmul.mubr.msk.f32.vlgmr.msra.gmra.mxu1 %vm1622_vm3, %v1708_v40 }
 0x44a   :  { %3334 = vmatpush3.msra.mxu1 %v3918_v48 }
 0x44b   :  { %3337 = vmatprep.mubr.msk.f32.mxu1 %vm1622_vm3, %v1709_v43  ;;  %3335 = vmatprep.subr.mxu1 %v1186_v13 }
 0x44c   :  { %v3472_v58 = vpop.eup %3471  ;;  %3336 = vmatpush3.msra.mxu1 %v1186_v13 }
 0x44d   :  { %v1710_v61 = vmul.f32 %v3472_v58, %v3905_v17 }
 0x44f   :  { %3338 = vmatmul.mubr.msk.f32.vlgmr.msra.gmra.mxu1 %vm1622_vm3, %v1710_v61 }
 0x4fe   :  { %v3318_v44 = vpop.f32.mrf.mxu1 }
 0x500   :  { %v1783_v11 = vpop.f32.mrf.mxu1 }
 0x505   :  { %v3325_v34 = vpop.f32.mrf.mxu1 }
 0x507   :  { %v1864_v35 = vpop.f32.mrf.mxu1 }
 0x509   :  { %v3332_v20 = vpop.f32.mrf.mxu1 }
 0x50a   :  { %v2103_v46 = vcombine.low %v3318_v44, %v3332_v20  ;;  %v2104_v47 = vcombine.high %v3318_v44, %v3332_v20 }
 0x50b   :  { %v1945_v45 = vpop.f32.mrf.mxu1 }
 0x50c   :  { %v2111_v52 = vrot.slane %v2103_v46, %v3694_v50  ;;  %v2118_v53 = vrot.slane %v2104_v47, %v3694_v50  ;;  %v2035_v54 = vcombine.low %v1783_v11, %v1945_v45  ;;  %v2036_v55 = vcombine.high %v1783_v11, %v1945_v45 }
 0x50e   :  { %v2043_v3 = vrot.slane %v2035_v54, %v3694_v50  ;;  %v2050_v6 = vrot.slane %v2036_v55, %v3694_v50 }
 0x50f   :  { %v3339_v49 = vpop.f32.mrf.mxu1 }
 0x510   :  { %v2119_v51 = vcombine.low %v3325_v34, %v3339_v49  ;;  %v2120_v48 = vcombine.high %v3325_v34, %v3339_v49 }
 0x511   :  { %v2026_v17 = vpop.f32.mrf.mxu1 }
 0x512   :  { %v2127_v57 = vrot.slane %v2119_v51, %v3694_v50  ;;  %v2134_v59 = vrot.slane %v2120_v48, %v3694_v50  ;;  %v2051_v60 = vcombine.low %v1864_v35, %v2026_v17  ;;  %v2052_v62 = vcombine.high %v1864_v35, %v2026_v17  ;;  %v2339_v35 = vld [vmem:[%s4215_s3 + $0xa8] sm:$0xff] }
 0x513   :  { %3344 = vmatprep.subr.mxu0 %v2339_v35 }
 0x514   :  { %v2135_v63 = vcombine.low %v2111_v52, %v2127_v57  ;;  %v2136_v0 = vcombine.high %v2111_v52, %v2127_v57  ;;  %v2151_v1 = vcombine.low %v2118_v53, %v2134_v59  ;;  %v2152_v2 = vcombine.high %v2118_v53, %v2134_v59  ;;  %3345 = vmatpush3.msra.mxu0 %v2339_v35 }
 0x515   :  { %v2059_v7 = vrot.slane %v2051_v60, %v3694_v50  ;;  %v2066_v8 = vrot.slane %v2052_v62, %v3694_v50 }
 0x516   :  { %v2143_v9 = vrot.slane %v2135_v63, %v3696_v56  ;;  %v2150_v12 = vrot.slane %v2136_v0, %v3696_v56  ;;  %v2159_v4 = vrot.slane %v2151_v1, %v3696_v56  ;;  %v2166_v21 = vrot.slane %v2152_v2, %v3696_v56 }
 0x517   :  { %v2067_v5 = vcombine.low %v2043_v3, %v2059_v7  ;;  %v2068_v13 = vcombine.high %v2043_v3, %v2059_v7  ;;  %v2083_v18 = vcombine.low %v2050_v6, %v2066_v8  ;;  %v2084_v22 = vcombine.high %v2050_v6, %v2066_v8 }
 0x518   :  { %v2239_v23 = vcombine.low %v2143_v9, %v2150_v12  ;;  %v3125_v14 = vcombine.high %v2143_v9, %v2150_v12  ;;  %v2255_v15 = vcombine.low %v2159_v4, %v2166_v21  ;;  %v3126_v42 = vcombine.high %v2159_v4, %v2166_v21 }
 0x519   :  { %v2075_v16 = vrot.slane %v2067_v5, %v3696_v56  ;;  %v2082_v10 = vrot.slane %v2068_v13, %v3696_v56  ;;  %v2091_v19 = vrot.slane %v2083_v18, %v3696_v56  ;;  %v2098_v31 = vrot.slane %v2084_v22, %v3696_v56  ;;  %v3127_v22 = vld [vmem:[%s4216_s4 + $0x4] ss:$0 sm:$0xff] }
 0x51a   :  { %v2246_v28 = vrot.slane %v2239_v23, %v3694_v50  ;;  %v2254_v29 = vrot.slane %v3125_v14, %v3694_v50  ;;  %v2262_v32 = vrot.slane %v2255_v15, %v3694_v50  ;;  %v2270_v33 = vrot.slane %v3126_v42, %v3694_v50 }
 0x51b   :  { %v2171_v39 = vcombine.low %v2075_v16, %v2082_v10  ;;  %v3123_v30 = vcombine.high %v2075_v16, %v2082_v10  ;;  %v2187_v36 = vcombine.low %v2091_v19, %v2098_v31  ;;  %v3124_v37 = vcombine.high %v2091_v19, %v2098_v31 }
 0x51c   :  { %v2272_v38 = vcombine.high %v2246_v28, %v2254_v29  ;;  %v2288_v40 = vcombine.high %v2262_v32, %v2270_v33  ;;  %v2271_v43 = vcombine.low %v2246_v28, %v2254_v29  ;;  %v2287_v58 = vcombine.low %v2262_v32, %v2270_v33 }
 0x51d   :  { %v2178_v61 = vrot.slane %v2171_v39, %v3694_v50  ;;  %v2186_v44 = vrot.slane %v3123_v30, %v3694_v50  ;;  %v2194_v11 = vrot.slane %v2187_v36, %v3694_v50  ;;  %v2202_v34 = vrot.slane %v3124_v37, %v3694_v50  ;;  %v2338_v50 = vld [vmem:[%s4215_s3 + $0xa0] sm:$0xff]  ;;  %v2473_v37 = vld [vmem:[%s4215_s3 + $0xd0] sm:$0xff] }
 0x51e   :  { %v2286_v20 = vrot.slane %v2272_v38, %v3696_v56  ;;  %v2302_v45 = vrot.slane %v2288_v40, %v3696_v56  ;;  %v2279_v46 = vrot.slane %v2271_v43, %v3696_v56  ;;  %v2295_v47 = vrot.slane %v2287_v58, %v3696_v56  ;;  %3346 = vmatprep.subr.mxu0 %v2338_v50  ;;  %v2472_v38 = vld [vmem:[%s4215_s3 + $0xc8] sm:$0xff]  ;;  %v2471_v40 = vld [vmem:[%s4215_s3 + $0xc0] sm:$0xff] }
 0x51f   :  { %v2204_v49 = vcombine.high %v2178_v61, %v2186_v44  ;;  %v2220_v51 = vcombine.high %v2194_v11, %v2202_v34  ;;  %v2203_v48 = vcombine.low %v2178_v61, %v2186_v44  ;;  %v2219_v52 = vcombine.low %v2194_v11, %v2202_v34  ;;  %3347 = vmatpush3.msra.mxu0 %v2338_v50 }
 0x520   :  { %v2305_v53 = vcombine.low %v2286_v20, %v2302_v45  ;;  %v2304_v54 = vcombine.high %v2279_v46, %v2295_v47  ;;  %v2303_v55 = vcombine.low %v2279_v46, %v2295_v47  ;;  %v2306_v2 = vcombine.high %v2286_v20, %v2302_v45  ;;  %v3130_v20 = vld [vmem:[%s4216_s4 + $0x5] ss:$0 sm:$0xff]  ;;  %v3131_v46 = vld [vmem:[%s4216_s4 + $0x6] ss:$0 sm:$0xff] }
 0x521   :  { %v2218_v17 = vrot.slane %v2204_v49, %v3696_v56  ;;  %v2234_v57 = vrot.slane %v2220_v51, %v3696_v56  ;;  %v2211_v59 = vrot.slane %v2203_v48, %v3696_v56  ;;  %v2227_v60 = vrot.slane %v2219_v52, %v3696_v56 }
 0x522   :  { %2319 = vrot.lane.b32.xlu1 %v2305_v53, %s3530_s7  ;;  %2311 = vrot.lane.b32.xlu0 %v2304_v54, %s3531_s8  ;;  %v2586_v53 = vld [vmem:[%s4215_s3 + $0x118] sm:$0xff]  ;;  %v2585_v54 = vld [vmem:[%s4215_s3 + $0x110] sm:$0xff] }
 0x523   :  { %v2235_v62 = vcombine.low %v2211_v59, %v2227_v60  ;;  %v2238_v63 = vcombine.high %v2218_v17, %v2234_v57  ;;  %v2236_v0 = vcombine.high %v2211_v59, %v2227_v60  ;;  %v2237_v1 = vcombine.low %v2218_v17, %v2234_v57  ;;  %3362 = vmatprep.subr.mxu0 %v2586_v53  ;;  %v2583_v17 = vld [vmem:[%s4215_s3 + $0x100] sm:$0xff]  ;;  %v2582_v57 = vld [vmem:[%s4215_s3 + $0xf8] sm:$0xff]  ;;  %v2581_v59 = vld [vmem:[%s4215_s3 + $0xf0] sm:$0xff] }
 0x524   :  { %v2580_v60 = vld [vmem:[%s4215_s3 + $0xe8] sm:$0xff] }
 0x526   :  { %2325 = vrot.lane.b32.xlu0 %v2238_v63, %s3532_s9  ;;  %2309 = vrot.lane.b32.xlu1 %v2236_v0, %s3531_s8  ;;  %v3132_v63 = vld [vmem:[%s4216_s4 + $0x7] ss:$0 sm:$0xff] }
 0x52a   :  { %2317 = vrot.lane.b32.xlu1 %v2237_v1, %s3530_s7  ;;  %s3539_s7 = smov 1.0  }
 0x52e   :  { %2327 = vrot.lane.b32.xlu1 %v2306_v2, %s3532_s9 }
 0x594   :  { %v2320_v3 = vpop.permute.xlu1 %2319  ;;  %v2312_v6 = vpop.permute.xlu0 %2311 }
 0x595   :  { %v2332_v9 = vsel %vm1255_vm2, %v2303_v55, %v2312_v6  ;;  %v2584_v55 = vld [vmem:[%s4215_s3 + $0x108] sm:$0xff] }
 0x596   :  { %v2334_v5 = vsel %vm1622_vm3, %v2332_v9, %v2320_v3 }
 0x598   :  { %v2310_v7 = vpop.permute.xlu1 %2309  ;;  %v2326_v12 = vpop.permute.xlu0 %2325 }
 0x599   :  { %v2331_v56 = vsel %vm1255_vm2, %v2235_v62, %v2310_v7  ;;  %v2579_v62 = vld [vmem:[%s4215_s3 + $0xe0] sm:$0xff] }
 0x59c   :  { %v2318_v8 = vpop.permute.xlu1 %2317 }
 0x59d   :  { %v2333_v4 = vsel %vm1622_vm3, %v2331_v56, %v2318_v8  ;;  %vm2853_vm3 = vcmask 7168  }
 0x59e   :  { %v2336_v21 = vsel %vm2335_vm4, %v2333_v4, %v2326_v12 }
 0x59f   :  { %3348 = vmatprep.mubr.msk.f32.mxu0 %vm129_vm1, %v2336_v21 }
 0x5a0   :  { %v2328_v13 = vpop.permute.xlu1 %2327 }
 0x5a1   :  { %v2337_v18 = vsel %vm2335_vm4, %v2334_v5, %v2328_v13 }
 0x5a2   :  { %3349 = vmatmul.mubr.msk.f32.vlgmr.msra.gmra.mxu0 %vm129_vm1, %v2337_v18 }
 0x5a3   :  { %3363 = vmatpush3.msra.mxu0 %v2586_v53 }
 0x5a4   :  { %3364 = vmatprep.subr.mxu0 %v2585_v54 }
 0x5a5   :  { %3365 = vmatpush3.msra.mxu0 %v2585_v54 }
 0x5a6   :  { %3366 = vmatprep.subr.mxu0 %v2584_v55 }
 0x5a7   :  { %3367 = vmatpush3.msra.mxu0 %v2584_v55 }
 0x5a8   :  { %3368 = vmatprep.subr.mxu0 %v2583_v17 }
 0x5a9   :  { %3369 = vmatpush3.msra.mxu0 %v2583_v17  ;;  %v3139_v17 = vld [vmem:[%s4216_s4 + $0xa] ss:$0 sm:$0xff] }
 0x5aa   :  { %3370 = vmatprep.subr.mxu0 %v2582_v57 }
 0x5ab   :  { %3371 = vmatpush3.msra.mxu0 %v2582_v57 }
 0x5ac   :  { %3372 = vmatprep.subr.mxu0 %v2581_v59 }
 0x5ad   :  { %3373 = vmatpush3.msra.mxu0 %v2581_v59 }
 0x5ae   :  { %3374 = vmatprep.subr.mxu0 %v2580_v60 }
 0x5af   :  { %3375 = vmatpush3.msra.mxu0 %v2580_v60 }
 0x5b0   :  { %3376 = vmatprep.subr.mxu0 %v2579_v62 }
 0x5b1   :  { %3377 = vmatpush3.msra.mxu0 %v2579_v62  ;;  %v3533_v62 = vmov 0  }
 0x5b2   :  { %3426 = vset.pattern.permute.xlu1 %v3533_v62  ;;  %3427 = vset.pattern.permute.xlu0 %v3533_v62 }
 0x662   :  { %v3350_v23 = vpop.f32.mrf.mxu0 }
 0x663   :  { %v2425_v14 = vadd.f32 %v3350_v23, %v3127_v22 }
 0x664   :  { %v2419_v15 = vpop.f32.mrf.mxu0 }
 0x665   :  { %v2420_v42 = vadd.f32 %v3127_v22, %v2419_v15  ;;  %v2429_v16 = vadd.f32 %v2425_v14, %v3635_v25 }
 0x667   :  { %v2435_v10 = vsel %vm129_vm1, %v2429_v16, 0.0  ;;  %v2428_v19 = vadd.f32 %v2420_v42, %v3633_v24  ;;  %v2474_v24 = vld [vmem:[%s4215_s3 + $0xd8] sm:$0xff] }
 0x668   :  { %2436 = vadd.xlane.f32.xlu1 %v2435_v10  ;;  %3351 = vmatprep.subr.mxu1 %v2474_v24 }
 0x669   :  { %v2432_v31 = vsel %vm129_vm1, %v2428_v19, 0.0  ;;  %3352 = vmatpush3.msra.mxu1 %v2474_v24 }
 0x66a   :  { %2433 = vadd.xlane.f32.xlu0 %v2432_v31  ;;  %3353 = vmatprep.subr.mxu1 %v2473_v37 }
 0x66b   :  { %3354 = vmatpush3.msra.mxu1 %v2473_v37 }
 0x66c   :  { %3355 = vmatprep.subr.mxu1 %v2472_v38 }
 0x66d   :  { %3356 = vmatpush3.msra.mxu1 %v2472_v38 }
 0x66e   :  { %3357 = vmatprep.subr.mxu1 %v2471_v40 }
 0x66f   :  { %3358 = vmatpush3.msra.mxu1 %v2471_v40 }
 0x6f1   :  { %v2437_v26 = vpop.xlane.xlu1 %2436 }
 0x6f2   :  { %v2440_v27 = vmul.f32 0.03125, %v2437_v26 }
 0x6f3   :  { %v2434_v28 = vpop.xlane.xlu0 %2433 }
 0x6f4   :  { %v2439_v29 = vmul.f32 0.03125, %v2434_v28  ;;  %v2442_v32 = vsub.f32 %v2429_v16, %v2440_v27 }
 0x6f6   :  { %v2441_v33 = vsub.f32 %v2428_v19, %v2439_v29  ;;  %v2444_v36 = vmul.f32 %v2442_v32, %v2442_v32  ;;  %v3135_v19 = vld [vmem:[%s4216_s4 + $0x8] ss:$0 sm:$0xff] }
 0x6f8   :  { %v2443_v39 = vmul.f32 %v2441_v33, %v2441_v33  ;;  %v2448_v25 = vsel %vm129_vm1, %v2444_v36, 0.0 }
 0x6fa   :  { %v2445_v30 = vsel %vm129_vm1, %v2443_v39, 0.0 }
 0x6fb   :  { %2446 = vadd.xlane.f32.xlu0 %v2445_v30 }
 0x6ff   :  { %2449 = vadd.xlane.f32.xlu0 %v2448_v25 }
 0x784   :  { %v2447_v43 = vpop.xlane.xlu0 %2446 }
 0x785   :  { %v2451_v58 = vmul.f32 0.03125, %v2447_v43 }
 0x787   :  { %v2453_v61 = vadd.f32 1e-12, %v2451_v58 }
 0x788   :  { %v2450_v44 = vpop.xlane.xlu0 %2449 }
 0x789   :  { %3473 = vrsqrt.f32 %v2453_v61  ;;  %v2452_v11 = vmul.f32 0.03125, %v2450_v44  ;;  %v2718_v44 = vld [vmem:[%s4215_s3 + $0x138] sm:$0xff] }
 0x78a   :  { %3381 = vmatprep.subr.mxu1 %v2718_v44 }
 0x78b   :  { %v2454_v34 = vadd.f32 1e-12, %v2452_v11  ;;  %v2717_v11 = vld [vmem:[%s4215_s3 + $0x130] sm:$0xff] }
 0x78d   :  { %3475 = vrsqrt.f32 %v2454_v34  ;;  %v2716_v34 = vld [vmem:[%s4215_s3 + $0x128] sm:$0xff] }
 0x796   :  { %v3474_v35 = vpop.eup %3473 }
 0x797   :  { %v2457_v45 = vmul.f32 %v3474_v35, %v2441_v33  ;;  %v2715_v35 = vld [vmem:[%s4215_s3 + $0x120] sm:$0xff] }
 0x799   :  { %v2463_v47 = vmul.f32 %v3130_v20, %v2457_v45 }
 0x79a   :  { %v3476_v49 = vpop.eup %3475 }
 0x79b   :  { %v2458_v51 = vmul.f32 %v3476_v49, %v2442_v32  ;;  %v4029_v48 = vadd.f32 %v3131_v46, %v2463_v47 }
 0x79d   :  { %v2464_v52 = vmul.f32 %v3130_v20, %v2458_v51  ;;  %3359 = vmatprep.mubr.msk.f32.mxu1 %vm129_vm1, %v4029_v48 }
 0x79f   :  { %v2470_v50 = vadd.f32 %v3131_v46, %v2464_v52  ;;  %v3138_v52 = vld [vmem:[%s4216_s4 + $0x9] ss:$0 sm:$0xff] }
 0x7a1   :  { %3360 = vmatmul.mubr.msk.f32.vlgmr.msra.gmra.mxu1 %vm129_vm1, %v2470_v50 }
 0x7a2   :  { %3382 = vmatpush3.msra.mxu1 %v2718_v44 }
 0x7a3   :  { %3383 = vmatprep.subr.mxu1 %v2717_v11 }
 0x7a4   :  { %3384 = vmatpush3.msra.mxu1 %v2717_v11 }
 0x7a5   :  { %3385 = vmatprep.subr.mxu1 %v2716_v34 }
 0x7a6   :  { %3386 = vmatpush3.msra.mxu1 %v2716_v34 }
 0x7a7   :  { %3387 = vmatprep.subr.mxu1 %v2715_v35 }
 0x7a8   :  { %3388 = vmatpush3.msra.mxu1 %v2715_v35 }
 0x861   :  { %v3361_v0 = vpop.f32.mrf.mxu1 }
 0x862   :  { %v2558_v1 = vadd.f32 %v3361_v0, %v3132_v63 }
 0x863   :  { %v2552_v2 = vpop.f32.mrf.mxu1 }
 0x864   :  { %v2562_v3 = vmul.f32 %v2558_v1, %v2558_v1  ;;  %v2553_v6 = vadd.f32 %v3132_v63, %v2552_v2  ;;  %v4092_v63 = vand.u32 127, %v404_v41 }
 0x866   :  { %v2564_v7 = vmul.f32 %v2562_v3, %v2558_v1  ;;  %v2561_v56 = vmul.f32 %v2553_v6, %v2553_v6  ;;  %vm2811_vm5 = vcmp.lt.s32.totalorder %v4092_v63, 11  ;;  %vm2884_vm6 = vcmp.ge.s32.totalorder %v4092_v63, 11 }
 0x867   :  { %vm2885_vm7 = vcmp.lt.s32.totalorder %v4092_v63, 22  ;;  %vm2973_vm9 = vcmp.ge.s32.totalorder %v4092_v63, 22  ;;  %vm2974_vm10 = vcmp.lt.s32.totalorder %v4092_v63, 35 }
 0x868   :  { %v2566_v8 = vmul.f32 0.044715, %v2564_v7  ;;  %v2563_v9 = vmul.f32 %v2561_v56, %v2553_v6  ;;  %vm4102_vm8 = vmand %vm2884_vm6, %vm2885_vm7  ;;  %v4113_v7 = vld [vmem:[%s4214_s2] sm:$0xff]  ;;  %v4119_v56 = vld [vmem:[%s4214_s2 + $0x8] sm:$0xff]  ;;  %s3537_s2 = smov 127  }
 0x869   :  { %vm2975_vm11 = vmand %vm2973_vm9, %vm2974_vm10  ;;  %vm2805_vm2 = vcmp.ge.s32.totalorder %v4119_v56, 0 }
 0x86a   :  { %v2568_v12 = vadd.f32 %v2566_v8, %v2558_v1  ;;  %v2565_v4 = vmul.f32 0.044715, %v2563_v9  ;;  %v3534_v8 = vmov 1   ;;  %v3535_v9 = vmov 2  }
 0x86c   :  { %v2570_v21 = vmul.f32 0.7978846, %v2568_v12  ;;  %v2567_v5 = vadd.f32 %v2565_v4, %v2553_v6 }
 0x86e   :  { %3477 = vtanh.f32 %v2570_v21  ;;  %v2569_v13 = vmul.f32 0.7978846, %v2567_v5 }
 0x870   :  { %3479 = vtanh.f32 %v2569_v13 }
 0x87b   :  { %v3478_v18 = vpop.eup %3477 }
 0x87c   :  { %v2574_v22 = vadd.f32 1.0, %v3478_v18 }
 0x87d   :  { %v3480_v23 = vpop.eup %3479 }
 0x87e   :  { %v2573_v14 = vadd.f32 1.0, %v3480_v23  ;;  %v2576_v15 = vmul.f32 0.5, %v2574_v22 }
 0x880   :  { %v2575_v42 = vmul.f32 0.5, %v2573_v14  ;;  %v2578_v10 = vmul.f32 %v2576_v15, %v2558_v1 }
 0x882   :  { %v2577_v16 = vmul.f32 %v2575_v42, %v2553_v6 }
 0x884   :  { %3378 = vmatprep.mubr.msk.f32.mxu0 %vm36_vm0, %v2577_v16 }
 0x885   :  { %3379 = vmatmul.mubr.msk.f32.vlgmr.msra.gmra.mxu0 %vm36_vm0, %v2578_v10 }
 0x945   :  { %v3380_v31 = vpop.f32.mrf.mxu0 }
 0x946   :  { %v2670_v26 = vadd.f32 %v3380_v31, %v3135_v19 }
 0x947   :  { %v2664_v27 = vpop.f32.mrf.mxu0 }
 0x948   :  { %v2665_v28 = vadd.f32 %v3135_v19, %v2664_v27  ;;  %v2674_v29 = vadd.f32 %v2670_v26, %v2470_v50 }
 0x94a   :  { %v2680_v32 = vsel %vm129_vm1, %v2674_v29, 0.0  ;;  %v2673_v33 = vadd.f32 %v2665_v28, %v4029_v48 }
 0x94b   :  { %2681 = vadd.xlane.f32.xlu0 %v2680_v32 }
 0x94c   :  { %v2677_v39 = vsel %vm129_vm1, %v2673_v33, 0.0 }
 0x94d   :  { %2678 = vadd.xlane.f32.xlu1 %v2677_v39 }
 0x9d4   :  { %v2682_v30 = vpop.xlane.xlu0 %2681 }
 0x9d5   :  { %v2684_v36 = vmul.f32 0.03125, %v2682_v30 }
 0x9d6   :  { %v2679_v25 = vpop.xlane.xlu1 %2678 }
 0x9d7   :  { %v2686_v24 = vsub.f32 %v2674_v29, %v2684_v36  ;;  %v2683_v37 = vmul.f32 0.03125, %v2679_v25 }
 0x9d9   :  { %v2685_v38 = vsub.f32 %v2673_v33, %v2683_v37  ;;  %v2688_v40 = vmul.f32 %v2686_v24, %v2686_v24 }
 0x9db   :  { %v2692_v43 = vsel %vm129_vm1, %v2688_v40, 0.0  ;;  %v2687_v58 = vmul.f32 %v2685_v38, %v2685_v38 }
 0x9dc   :  { %2693 = vadd.xlane.f32.xlu0 %v2692_v43 }
 0x9dd   :  { %v2689_v61 = vsel %vm129_vm1, %v2687_v58, 0.0 }
 0x9de   :  { %2690 = vadd.xlane.f32.xlu1 %v2689_v61 }
 0xa65   :  { %v2694_v20 = vpop.xlane.xlu0 %2693 }
 0xa66   :  { %v2696_v45 = vmul.f32 0.03125, %v2694_v20 }
 0xa67   :  { %v2691_v46 = vpop.xlane.xlu1 %2690 }
 0xa68   :  { %v2698_v47 = vadd.f32 1e-12, %v2696_v45  ;;  %v2695_v49 = vmul.f32 0.03125, %v2691_v46 }
 0xa6a   :  { %3481 = vrsqrt.f32 %v2698_v47  ;;  %v2697_v51 = vadd.f32 1e-12, %v2695_v49 }
 0xa6c   :  { %3483 = vrsqrt.f32 %v2697_v51 }
 0xa77   :  { %v3482_v48 = vpop.eup %3481 }
 0xa78   :  { %v2702_v50 = vmul.f32 %v3482_v48, %v2686_v24  ;;  %v3536_v48 = vmov 0.0  }
 0xa79   :  { %v3484_v53 = vpop.eup %3483 }
 0xa7a   :  { %v2701_v54 = vmul.f32 %v3484_v53, %v2685_v38  ;;  %v2708_v55 = vmul.f32 %v3138_v52, %v2702_v50  ;;  %v4165_v50 = vsel %vm2805_vm2, 1.0, %v3536_v48 }
 0xa7c   :  { %v2707_v57 = vmul.f32 %v3138_v52, %v2701_v54  ;;  %v2714_v60 = vadd.f32 %v3139_v17, %v2708_v55 }
 0xa7e   :  { %v2713_v59 = vadd.f32 %v3139_v17, %v2707_v57  ;;  %v2867_v17 = vsel %vm2853_vm3, %v4165_v50, 0.0 }
 0xa80   :  { %3389 = vmatprep.mubr.msk.f32.mxu1 %vm129_vm1, %v2713_v59 }
 0xa81   :  { %3390 = vmatmul.mubr.msk.f32.vlgmr.msra.gmra.mxu1 %vm129_vm1, %v2714_v60  ;;  %vm2804_vm1 = vcmp.ge.s32.totalorder %v4113_v7, 0 }
 0xa82   :  { %v4163_v52 = vsel %vm2804_vm1, 1.0, %v3536_v48 }
 0xa83   :  { %v2866_v55 = vsel %vm2853_vm3, %v4163_v52, 0.0 }
 0xa84   :  { %v2868_v59 = vadd.f32 %v2867_v17, %v2866_v55 }
 0xb41   :  { %v4097_v0 = vpop.f32.mrf.mxu1 }
 0xb42   :  { %v2814_v1 = vsel %vm2811_vm5, %v4097_v0, -1e+30  ;;  %v2888_v6 = vsel %vm4102_vm8, %v4097_v0, -1e+30  ;;  %v2977_v4 = vsel %vm2975_vm11, %v4097_v0, -1e+30 }
 0xb43   :  { %2817 = vmax.xlane.f32.xlu0 %v2814_v1  ;;  %v4100_v2 = vpop.f32.mrf.mxu1 }
 0xb44   :  { %v2813_v41 = vsel %vm2811_vm5, %v4100_v2, -1e+30  ;;  %v2887_v12 = vsel %vm4102_vm8, %v4100_v2, -1e+30  ;;  %v2976_v21 = vsel %vm2975_vm11, %v4100_v2, -1e+30 }
 0xb45   :  { %2815 = vmax.xlane.f32.xlu1 %v2813_v41 }
 0xb47   :  { %2891 = vmax.xlane.f32.xlu0 %v2888_v6 }
 0xb56   :  { %2836 = vperm.xlu1 %3426, %v4113_v7  }
 0xb5a   :  { %3428 = vset.pattern.permute.xlu1 %v3534_v8 }
 0xb5d   :  { %2839 = vperm.xlu0 %3427, %v4119_v56  }
 0xb61   :  { %3430 = vset.pattern.permute.xlu0 %v3535_v9 }
 0xb7a   :  { %2889 = vmax.xlane.f32.xlu1 %v2887_v12 }
 0xb7c   :  { %2980 = vmax.xlane.f32.xlu0 %v2977_v4 }
 0xb8b   :  { %2910 = vperm.xlu1 %3428, %v4113_v7  }
 0xb8f   :  { %2913 = vperm.xlu1 %3428, %v4119_v56  }
 0xb93   :  { %3429 = vset.pattern.permute.xlu1 %v3535_v9 }
 0xb94   :  { %2999 = vperm.xlu1 %3429, %v4113_v7  }
 0xbb8   :  { %2978 = vmax.xlane.f32.xlu1 %v2976_v21 }
 0xbcc   :  { %v4132_v5 = vpop.xlane.xlu0 %2817 }
 0xbcd   :  { %v2820_v42 = vsub.f32 %v2814_v1, %v4132_v5 }
 0xbce   :  { %v4134_v13 = vpop.xlane.xlu1 %2815 }
 0xbcf   :  { %v2823_v16 = vmul.f32 1.442695, %v2820_v42  ;;  %v2819_v19 = vsub.f32 %v2813_v41, %v4134_v13  ;;  %v3431_v42 = vpack.i.bf16 %v4165_v50, %v4163_v52 }
 0xbd0   :  { %v4137_v22 = vpop.xlane.xlu0 %2891 }
 0xbd1   :  { %v2894_v10 = vsub.f32 %v2888_v6, %v4137_v22  ;;  %3485 = vpow2.f32 %v2823_v16  ;;  %v2821_v27 = vmul.f32 1.442695, %v2819_v19 }
 0xbd2   :  { %v2837_v18 = vpop.permute.xlu1 %2836 }
 0xbd3   :  { %vm2841_vm12 = vcmp.eq.s32.totalorder %v4092_v63, %v2837_v18  ;;  %v2897_v31 = vmul.f32 1.442695, %v2894_v10 }
 0xbd4   :  { %v2843_v23 = vsel %vm2841_vm12, %v4100_v2, 0.0 }
 0xbd5   :  { %2845 = vadd.xlane.f32.xlu1 %v2843_v23  ;;  %3487 = vpow2.f32 %v2897_v31 }
 0xbd6   :  { %3489 = vpow2.f32 %v2821_v27 }
 0xbd8   :  { %v2840_v14 = vpop.permute.xlu0 %2839 }
 0xbd9   :  { %vm2842_vm13 = vcmp.eq.s32.totalorder %v4092_v63, %v2840_v14 }
 0xbda   :  { %v2844_v15 = vsel %vm2842_vm13, %v4097_v0, 0.0 }
 0xbdb   :  { %2847 = vadd.xlane.f32.xlu0 %v2844_v15 }
 0xbde   :  { %v3486_v30 = vpop.eup %3485 }
 0xbe2   :  { %v3488_v25 = vpop.eup %3487 }
 0xbe3   :  { %v3490_v37 = vpop.eup %3489 }
 0xc03   :  { %v4145_v26 = vpop.xlane.xlu1 %2889 }
 0xc04   :  { %v2893_v29 = vsub.f32 %v2887_v12, %v4145_v26 }
 0xc05   :  { %v4155_v43 = vpop.xlane.xlu0 %2980 }
 0xc06   :  { %v2895_v39 = vmul.f32 1.442695, %v2893_v29  ;;  %v2983_v58 = vsub.f32 %v2977_v4, %v4155_v43 }
 0xc07   :  { %v2911_v28 = vpop.permute.xlu1 %2910 }
 0xc08   :  { %vm2915_vm14 = vcmp.eq.s32.totalorder %v4092_v63, %v2911_v28  ;;  %3491 = vpow2.f32 %v2895_v39  ;;  %v2986_v61 = vmul.f32 1.442695, %v2983_v58 }
 0xc09   :  { %v2917_v32 = vsel %vm2915_vm14, %v4100_v2, 0.0 }
 0xc0a   :  { %2919 = vadd.xlane.f32.xlu1 %v2917_v32  ;;  %3493 = vpow2.f32 %v2986_v61 }
 0xc0b   :  { %v2914_v33 = vpop.permute.xlu1 %2913 }
 0xc0c   :  { %vm2916_vm15 = vcmp.eq.s32.totalorder %v4092_v63, %v2914_v33 }
 0xc0d   :  { %v2918_v36 = vsel %vm2916_vm15, %v4097_v0, 0.0 }
 0xc0e   :  { %2827 = vadd.xlane.f32.xlu1 %v3486_v30  ;;  %2921 = vadd.xlane.f32.xlu0 %v2918_v36 }
 0xc0f   :  { %v3000_v24 = vpop.permute.xlu1 %2999 }
 0xc10   :  { %vm3004_vm0 = vcmp.eq.s32.totalorder %v4092_v63, %v3000_v24 }
 0xc11   :  { %v3006_v38 = vsel %vm3004_vm0, %v4100_v2, 0.0 }
 0xc12   :  { %2901 = vadd.xlane.f32.xlu1 %v3488_v25 }
 0xc15   :  { %v3492_v40 = vpop.eup %3491 }
 0xc16   :  { %2825 = vadd.xlane.f32.xlu1 %v3490_v37 }
 0xc17   :  { %v3494_v44 = vpop.eup %3493 }
 0xc1a   :  { %3008 = vadd.xlane.f32.xlu1 %v3006_v38 }
 0xc1e   :  { %2899 = vadd.xlane.f32.xlu1 %v3492_v40 }
 0xc24   :  { %3002 = vperm.xlu0 %3430, %v4119_v56  }
 0xc41   :  { %v4158_v11 = vpop.xlane.xlu1 %2978 }
 0xc42   :  { %v2982_v35 = vsub.f32 %v2976_v21, %v4158_v11 }
 0xc43   :  { %2990 = vadd.xlane.f32.xlu0 %v3494_v44 }
 0xc44   :  { %v2984_v45 = vmul.f32 1.442695, %v2982_v35 }
 0xc5e   :  { %v2846_v34 = vpop.xlane.xlu1 %2845 }
 0xc64   :  { %v2848_v46 = vpop.xlane.xlu0 %2847 }
 0xc93   :  { %v2920_v20 = vpop.xlane.xlu1 %2919 }
 0xc97   :  { %v2828_v47 = vpop.xlane.xlu1 %2827  ;;  %v2922_v49 = vpop.xlane.xlu0 %2921 }
 0xc98   :  { %3495 = vlog2.f32 %v2828_v47 }
 0xc99   :  { %3497 = vpow2.f32 %v2984_v45 }
 0xc9b   :  { %v2902_v51 = vpop.xlane.xlu1 %2901 }
 0xc9c   :  { %3499 = vlog2.f32 %v2902_v51 }
 0xc9f   :  { %v3003_v53 = vpop.permute.xlu0 %3002  ;;  %v2826_v54 = vpop.xlane.xlu1 %2825 }
 0xca0   :  { %vm3005_vm4 = vcmp.eq.s32.totalorder %v4092_v63, %v3003_v53  ;;  %3501 = vlog2.f32 %v2826_v54 }
 0xca1   :  { %v3007_v57 = vsel %vm3005_vm4, %v4097_v0, 0.0 }
 0xca2   :  { %3010 = vadd.xlane.f32.xlu1 %v3007_v57 }
 0xca3   :  { %v3009_v60 = vpop.xlane.xlu1 %3008 }
 0xca5   :  { %v3496_v62 = vpop.eup %3495 }
 0xca6   :  { %v2832_v1 = vmul.f32 0.6931472, %v3496_v62  ;;  %2869 = vadd.xlane.f32.xlu1 %v2868_v59  ;;  %v3498_v3 = vpop.eup %3497 }
 0xca7   :  { %v2900_v2 = vpop.xlane.xlu1 %2899 }
 0xca8   :  { %3503 = vlog2.f32 %v2900_v2  ;;  %v2834_v6 = vadd.f32 %v2832_v1, %v4132_v5 }
 0xca9   :  { %v3500_v41 = vpop.eup %3499 }
 0xcaa   :  { %v2906_v7 = vmul.f32 0.6931472, %v3500_v41  ;;  %2988 = vadd.xlane.f32.xlu1 %v3498_v3  ;;  %v2850_v0 = vsub.f32 %v2834_v6, %v2848_v46 }
 0xcac   :  { %v2908_v56 = vadd.f32 %v2906_v7, %v4137_v22  ;;  %v2852_v18 = vmul.f32 %v4165_v50, %v2850_v0 }
 0xcad   :  { %v3502_v63 = vpop.eup %3501 }
 0xcae   :  { %v2830_v8 = vmul.f32 0.6931472, %v3502_v63  ;;  %v2924_v9 = vsub.f32 %v2908_v56, %v2922_v49  ;;  %v2855_v22 = vsel %vm2853_vm3, %v2852_v18, 0.0 }
 0xcb0   :  { %v2833_v12 = vadd.f32 %v2830_v8, %v4134_v13  ;;  %v2926_v4 = vmul.f32 %v4165_v50, %v2924_v9 }
 0xcb2   :  { %2931 = vrot.lane.b32.xlu0 %v2926_v4, %s3537_s2  ;;  %v2849_v21 = vsub.f32 %v2833_v12, %v2846_v34 }
 0xcb4   :  { %v2851_v23 = vmul.f32 %v4163_v52, %v2849_v21 }
 0xcb5   :  { %v3504_v5 = vpop.eup %3503 }
 0xcb6   :  { %v2904_v14 = vmul.f32 0.6931472, %v3504_v5  ;;  %v2854_v15 = vsel %vm2853_vm3, %v2851_v23, 0.0 }
 0xcb7   :  { %v2856_v16 = vadd.f32 %v2855_v22, %v2854_v15 }
 0xcb8   :  { %v2907_v13 = vadd.f32 %v2904_v14, %v4145_v26 }
 0xcba   :  { %v2923_v10 = vsub.f32 %v2907_v13, %v2920_v20 }
 0xcbb   :  { %3432 = vrot.lane.b32.xlu1 %v3431_v42, %s3537_s2 }
 0xcbc   :  { %v2925_v19 = vmul.f32 %v4163_v52, %v2923_v10 }
 0xcbf   :  { %2929 = vrot.lane.b32.xlu1 %v2925_v19, %s3537_s2 }
 0xccc   :  { %v2991_v29 = vpop.xlane.xlu0 %2990 }
 0xce3   :  { %2857 = vadd.xlane.f32.xlu1 %v2856_v16 }
 0xd24   :  { %v2932_v46 = vpop.permute.xlu0 %2931 }
 0xd2b   :  { %v3011_v31 = vpop.xlane.xlu1 %3010 }
 0xd2f   :  { %v2870_v27 = vpop.xlane.xlu1 %2869 }
 0xd30   :  { %v2871_v20 = vrot.slane %v2870_v27, 4 }
 0xd32   :  { %v2872_v47 = vadd.f32 %v2871_v20, %v2870_v27 }
 0xd33   :  { %v2989_v28 = vpop.xlane.xlu1 %2988 }
 0xd34   :  { %3505 = vlog2.f32 %v2989_v28  ;;  %v2873_v51 = vrot.slane %v2872_v47, 2 }
 0xd35   :  { %3507 = vlog2.f32 %v2991_v29 }
 0xd36   :  { %v2874_v55 = vadd.f32 %v2873_v51, %v2872_v47 }
 0xd37   :  { %v3433_v32 = vpop.permute.xlu1 %3432 }
 0xd38   :  { %v3435_v33 = vunpack.i.h.bf16 %v3433_v32  ;;  %v3434_v39 = vunpack.i.l.bf16 %v3433_v32  ;;  %v2875_v57 = vrot.slane %v2874_v55, 1 }
 0xd3a   :  { %v2955_v30 = vsel %vm2853_vm3, %v3434_v39, 0.0  ;;  %v2956_v36 = vsel %vm2853_vm3, %v3435_v33, 0.0 }
 0xd3b   :  { %v2957_v26 = vadd.f32 %v2956_v36, %v2955_v30  ;;  %v2930_v45 = vpop.permute.xlu1 %2929 }
 0xd3c   :  { %v2935_v49 = vsel %vm2853_vm3, %v2930_v45, 0.0 }
 0xd3d   :  { %2958 = vadd.xlane.f32.xlu0 %v2957_v26 }
 0xd41   :  { %v3506_v25 = vpop.eup %3505 }
 0xd42   :  { %v2993_v24 = vmul.f32 0.6931472, %v3506_v25  ;;  %v3508_v37 = vpop.eup %3507 }
 0xd43   :  { %v2995_v58 = vmul.f32 0.6931472, %v3508_v37 }
 0xd44   :  { %v2996_v38 = vadd.f32 %v2993_v24, %v4158_v11  ;;  %v2936_v11 = vsel %vm2853_vm3, %v2932_v46, 0.0 }
 0xd45   :  { %v2997_v44 = vadd.f32 %v2995_v58, %v4155_v43  ;;  %v2937_v53 = vadd.f32 %v2936_v11, %v2935_v49 }
 0xd46   :  { %v3012_v40 = vsub.f32 %v2996_v38, %v3009_v60  ;;  %v2876_v60 = vadd.f32 %v2875_v57, %v2874_v55 }
 0xd47   :  { %v3013_v34 = vsub.f32 %v2997_v44, %v3011_v31 }
 0xd48   :  { %v3014_v61 = vmul.f32 %v4163_v52, %v3012_v40 }
 0xd49   :  { %v3015_v35 = vmul.f32 %v4165_v50, %v3013_v34 }
 0xd4a   :  { %3018 = vrot.lane.b32.xlu1 %v3014_v61, %s3538_s29 }
 0xd53   :  { %3020 = vrot.lane.b32.xlu0 %v3015_v35, %s3538_s29 }
 0xd6c   :  { %v2858_v48 = vpop.xlane.xlu1 %2857 }
 0xd6d   :  { %v2859_v52 = vrot.slane %v2858_v48, 4 }
 0xd6e   :  { %2938 = vadd.xlane.f32.xlu1 %v2937_v53 }
 0xd6f   :  { %v2860_v54 = vadd.f32 %v2859_v52, %v2858_v48 }
 0xd71   :  { %v2861_v43 = vrot.slane %v2860_v54, 2 }
 0xd73   :  { %v2862_v17 = vadd.f32 %v2861_v43, %v2860_v54 }
 0xd75   :  { %v2863_v50 = vrot.slane %v2862_v17, 1 }
 0xd77   :  { %v2864_v59 = vadd.f32 %v2863_v50, %v2862_v17 }
 0xd79   :  { %3392 = vpush %v2864_v59 }
 0xd7a   :  { %3394 = vpush %v2876_v60 }
 0xd7f   :  { %3437 = vrot.lane.b32.xlu1 %v3431_v42, %s3538_s29 }
 0xdaa   :  { %s4193_s30 = spop %3392 }
 0xdab   :  { %s3395_s6 = spop %3394 }
 0xdac   :  { %s2878_s8 = smax.f32 %s3539_s7, %s3395_s6 }
 0xdad   :  { %v2879_v62 = vstv %s2878_s8 }
 0xdae   :  { %3509 = vrcp.f32 %v2879_v62 }
 0xdbb   :  { %v3510_v1 = vpop.eup %3509 }
 0xdbc   :  { %3396 = vpush %v3510_v1  ;;  %v3019_v3 = vpop.permute.xlu1 %3018 }
 0xdbd   :  { %v3024_v6 = vsel %vm2853_vm3, %v3019_v3, 0.0 }
 0xdc6   :  { %v2959_v2 = vpop.xlane.xlu0 %2958 }
 0xdc7   :  { %v2960_v63 = vrot.slane %v2959_v2, 4 }
 0xdc9   :  { %v2961_v8 = vadd.f32 %v2960_v63, %v2959_v2 }
 0xdca   :  { %v3021_v41 = vpop.permute.xlu0 %3020 }
 0xdcb   :  { %v3025_v7 = vsel %vm2853_vm3, %v3021_v41, 0.0  ;;  %v2962_v9 = vrot.slane %v2961_v8, 2 }
 0xdcc   :  { %v3026_v56 = vadd.f32 %v3025_v7, %v3024_v6 }
 0xdcd   :  { %v2963_v18 = vadd.f32 %v2962_v9, %v2961_v8 }
 0xdce   :  { %3027 = vadd.xlane.f32.xlu1 %v3026_v56 }
 0xdcf   :  { %v2964_v13 = vrot.slane %v2963_v18, 1 }
 0xdd1   :  { %v2965_v31 = vadd.f32 %v2964_v13, %v2963_v18 }
 0xded   :  { %s4200_s9 = spop %3396 }
 0xdee   :  { %s2882_s18 = smul.f32 %s4200_s9, %s4193_s30 }
 0xdf7   :  { %v2939_v0 = vpop.xlane.xlu1 %2938 }
 0xdf8   :  { %v2940_v12 = vrot.slane %v2939_v0, 4 }
 0xdfa   :  { %v2941_v4 = vadd.f32 %v2940_v12, %v2939_v0 }
 0xdfb   :  { %v3438_v21 = vpop.permute.xlu1 %3437 }
 0xdfc   :  { %v2942_v23 = vrot.slane %v2941_v4, 2  ;;  %v3440_v5 = vunpack.i.h.bf16 %v3438_v21  ;;  %v3439_v14 = vunpack.i.l.bf16 %v3438_v21 }
 0xdfe   :  { %v3042_v15 = vsel %vm2853_vm3, %v3439_v14, 0.0  ;;  %v3043_v22 = vsel %vm2853_vm3, %v3440_v5, 0.0  ;;  %v2943_v42 = vadd.f32 %v2942_v23, %v2941_v4 }
 0xdff   :  { %v3044_v16 = vadd.f32 %v3043_v22, %v3042_v15 }
 0xe00   :  { %v2944_v10 = vrot.slane %v2943_v42, 1 }
 0xe01   :  { %3045 = vadd.xlane.f32.xlu0 %v3044_v16 }
 0xe02   :  { %v2945_v19 = vadd.f32 %v2944_v10, %v2943_v42 }
 0xe04   :  { %3398 = vpush %v2945_v19 }
 0xe05   :  { %3400 = vpush %v2965_v31 }
 0xe35   :  { %s4202_s10 = spop %3398 }
 0xe36   :  { %s3401_s11 = spop %3400 }
 0xe37   :  { %s2967_s12 = smax.f32 %s3539_s7, %s3401_s11 }
 0xe38   :  { %v2968_v27 = vstv %s2967_s12 }
 0xe39   :  { %3511 = vrcp.f32 %v2968_v27 }
 0xe46   :  { %v3512_v28 = vpop.eup %3511 }
 0xe47   :  { %3402 = vpush %v3512_v28 }
 0xe57   :  { %v3028_v29 = vpop.xlane.xlu1 %3027 }
 0xe58   :  { %v3029_v32 = vrot.slane %v3028_v29, 4 }
 0xe5a   :  { %v3030_v33 = vadd.f32 %v3029_v32, %v3028_v29 }
 0xe5c   :  { %v3031_v39 = vrot.slane %v3030_v33, 2 }
 0xe5e   :  { %v3032_v30 = vadd.f32 %v3031_v39, %v3030_v33 }
 0xe60   :  { %v3033_v36 = vrot.slane %v3032_v30, 1 }
 0xe62   :  { %v3034_v26 = vadd.f32 %v3033_v36, %v3032_v30 }
 0xe64   :  { %3404 = vpush %v3034_v26 }
 0xe78   :  { %s3403_s13 = spop %3402 }
 0xe79   :  { %s2971_s17 = smul.f32 %s3403_s13, %s4202_s10 }
 0xe7b   :  { %s2972_s20 = sadd.f32 %s2971_s17, %s2882_s18 }
 0xe8a   :  { %v3046_v25 = vpop.xlane.xlu0 %3045 }
 0xe8b   :  { %v3047_v24 = vrot.slane %v3046_v25, 4 }
 0xe8d   :  { %v3048_v37 = vadd.f32 %v3047_v24, %v3046_v25 }
 0xe8f   :  { %v3049_v38 = vrot.slane %v3048_v37, 2 }
 0xe91   :  { %v3050_v40 = vadd.f32 %v3049_v38, %v3048_v37 }
 0xe93   :  { %v3051_v58 = vrot.slane %v3050_v40, 1 }
 0xe95   :  { %v3052_v61 = vadd.f32 %v3051_v58, %v3050_v40  ;;  %s3405_s14 = spop %3404 }
 0xe97   :  { %3406 = vpush %v3052_v61 }
 0xec8   :  { %s3407_s15 = spop %3406 }
 0xec9   :  { %s3054_s16 = smax.f32 %s3539_s7, %s3407_s15 }
 0xeca   :  { %v3055_v44 = vstv %s3054_s16 }
 0xecb   :  { %3513 = vrcp.f32 %v3055_v44 }
 0xed8   :  { %v3514_v34 = vpop.eup %3513 }
 0xed9   :  { %3408 = vpush %v3514_v34 }
 0xf0a   :  { %s3409_s19 = spop %3408 }
 0xf0b   :  { %s3058_s0 = smul.f32 %s3409_s19, %s3405_s14 }
 0xf0d   :  { %s3059_s21 = sadd.f32 %s3058_s0, %s2972_s20 }
 0xf0f   :  { %3061 = sst [smem:[#allocation2]] %s3059_s21 }
 0xf10   :  { %3069 = dma.smem_to_hbm %s3540_s22, 16, %s4217_s5, [#allocation3]  }
 0xf11   :  { %3523 = dma.done.wait [#allocation3], 16  }
 0xf12   :  { %3524 = vsyncadd [#allocation3], 4294967280 }
 0xf13   :  { %3073 = sfence }
 0xf14   :  { %3074 = vsyncpa [#allocation3], 1 }

</bundles_post_ra>
